<compile_context>
chip_gen: v5e
topology: v5e:2x2
jax: 0.10.0
libtpu: 0.0.40
codegen_flags: <defaults>
</compile_context>

<pallas_src>
import functools

import jax
import jax.numpy as jnp
from jax.experimental import pallas as pl
from jax.experimental.pallas import tpu as pltpu


def _round_up(n: int, m: int) -> int:
    return ((n + m - 1) // m) * m


def _axis_tiling(n: int, unit: int, max_tile: int):
    """Returns (padded_size, tile) with tile | padded_size and tile % unit == 0."""
    if n <= max_tile:
        p = _round_up(n, unit)
        return p, p
    p = _round_up(n, max_tile)
    return p, max_tile


def _graphconv_kernel(srcnorm_ref, a_ref, x_ref, w_ref, b_ref, o_ref,
                      acc_ref, deg_ref, *, project_first: bool, relu: bool):
    """One (dst-tile, src-tile) grid step of a DGL GraphConv (norm='both')."""
    s = pl.program_id(1)

    @pl.when(s == 0)
    def _init():
        acc_ref[...] = jnp.zeros_like(acc_ref)
        deg_ref[...] = jnp.zeros_like(deg_ref)

    a = a_ref[...]                                            # bf16 (td, ts), used as-is
    # Apply the src-degree norm to the small operand (rows of X) in f32, with a
    # single bf16 cast right before the MXU (exact reassociation of
    # A @ (diag(s) X) == (A diag(s)) @ X).
    xs = (x_ref[...].astype(jnp.float32) * srcnorm_ref[...]).astype(jnp.bfloat16)

    if project_first:
        xw = jnp.dot(xs, w_ref[...], preferred_element_type=jnp.float32)
        acc_ref[...] += jnp.dot(a, xw.astype(jnp.bfloat16),
                                preferred_element_type=jnp.float32)
    else:
        acc_ref[...] += jnp.dot(a, xs, preferred_element_type=jnp.float32)

    # dst in-degree via an MXU ones-vector matmul (exact f32 counts for 0/1 A;
    # no f32 upcast of the adjacency tile, no VPU/store traffic).
    ones = jnp.ones((a.shape[1], 1), jnp.bfloat16)
    deg_ref[...] += jnp.dot(a, ones, preferred_element_type=jnp.float32)

    @pl.when(s == pl.num_programs(1) - 1)
    def _finalize():
        dst_norm = jax.lax.rsqrt(jnp.maximum(deg_ref[...], 1.0))   # (td, 1) f32
        if project_first:
            h = acc_ref[...]
        else:
            h = jnp.dot(acc_ref[...].astype(jnp.bfloat16), w_ref[...],
                        preferred_element_type=jnp.float32)
        h = h * dst_norm + b_ref[...]                # DGL order: dst norm before bias
        if relu:
            h = jnp.maximum(h, 0.0)
        o_ref[...] = h.astype(o_ref.dtype)


def _graphconv_pallas(adj_bf16, src_norm, x_bf16, w_bf16, b_f32, *,
                      tile_d: int, tile_s: int, relu: bool, out_dtype):
    """One GraphConv layer as a tiled pallas_call (dst parallel, src reduction)."""
    D_p, S_p = adj_bf16.shape
    F_in_p = x_bf16.shape[1]
    F_out_p = w_bf16.shape[1]
    nd, ns = D_p // tile_d, S_p // tile_s
    out_isize = jnp.dtype(out_dtype).itemsize

    # Real FLOP comparison on the padded shapes (project-first recomputes X @ W
    # once per dst tile under this tiling).
    agg_flops = 2 * D_p * S_p * F_in_p + 2 * D_p * F_in_p * F_out_p
    proj_flops = 2 * nd * S_p * F_in_p * F_out_p + 2 * D_p * S_p * F_out_p
    project_first = proj_flops < agg_flops
    acc_w = F_out_p if project_first else F_in_p

    kernel = functools.partial(_graphconv_kernel,
                               project_first=project_first, relu=relu)

    # VMEM budget (double-buffered streamed inputs + resident W/b + out + scratch).
    vmem_need = (2 * (tile_d * tile_s * 2            # A tile (bf16)
                      + tile_s * F_in_p * 2          # X tile (bf16)
                      + tile_s * 4)                  # src_norm tile (f32)
                 + F_in_p * F_out_p * 2              # W (resident, bf16)
                 + F_out_p * 4                       # bias (f32)
                 + 2 * tile_d * F_out_p * out_isize  # out tile
                 + tile_d * acc_w * 4 + tile_d * 4)  # scratch accumulators
    vmem_limit = int(min(max(2 * vmem_need + (8 << 20), 32 << 20), 64 << 20))

    flops = (proj_flops if project_first else agg_flops) + 2 * D_p * S_p
    cost = pl.CostEstimate(
        flops=int(flops),
        transcendentals=int(D_p),
        bytes_accessed=int(adj_bf16.size * 2
                           + nd * (x_bf16.size * 2 + src_norm.size * 4)
                           + w_bf16.size * 2 + b_f32.size * 4
                           + D_p * F_out_p * out_isize))

    return pl.pallas_call(
        kernel,
        out_shape=jax.ShapeDtypeStruct((D_p, F_out_p), out_dtype),
        grid=(nd, ns),
        in_specs=[
            pl.BlockSpec((tile_s, 1), lambda d, s: (s, 0)),         # src norm (f32)
            pl.BlockSpec((tile_d, tile_s), lambda d, s: (d, s)),    # A (bf16)
            pl.BlockSpec((tile_s, F_in_p), lambda d, s: (s, 0)),    # X (bf16)
            pl.BlockSpec((F_in_p, F_out_p), lambda d, s: (0, 0)),   # W (bf16)
            pl.BlockSpec((1, F_out_p), lambda d, s: (0, 0)),        # b (f32)
        ],
        out_specs=pl.BlockSpec((tile_d, F_out_p), lambda d, s: (d, 0)),
        scratch_shapes=[pltpu.VMEM((tile_d, acc_w), jnp.float32),
                        pltpu.VMEM((tile_d, 1), jnp.float32)],
        compiler_params=pltpu.CompilerParams(
            dimension_semantics=("parallel", "arbitrary"),
            vmem_limit_bytes=vmem_limit),
        cost_estimate=cost,
    )(src_norm, adj_bf16, x_bf16, w_bf16, b_f32)


def custom_gnn_model(params, adj1, adj2, x):
    """Forward pass of Custom_GNN_Model (two GraphConv layers + ReLU).

    adj1: (num_dst1, num_src1) dense {0,1} adjacency of mfgs[0]
    adj2: (num_dst2, num_dst1) dense {0,1} adjacency of mfgs[1]
    x:    (num_src1, in_feats) source-node features
    """
    D1, S1 = adj1.shape
    D2, D1b = adj2.shape
    assert D1b == D1, (adj1.shape, adj2.shape)
    F_in, F_h = params["w1"].shape
    F_out = params["w2"].shape[1]

    # Lane axes of the adjacencies (S1, D1) -> multiples of 128; D2 is only a
    # sublane/row dim.  Feature dims -> multiples of 128 lanes.
    S1_p, ts1 = _axis_tiling(S1, 128, 512)
    D1_p, ts2 = _axis_tiling(D1, 128, 512)
    td1 = 256 if D1_p % 256 == 0 else 128
    D2_p, td2 = _axis_tiling(D2, 16, 256)
    F_in_p, F_h_p, F_out_p = (_round_up(f, 128) for f in (F_in, F_h, F_out))

    def pad2(a, rows, cols, dtype):
        a = a.astype(dtype)
        return jnp.pad(a, ((0, rows - a.shape[0]), (0, cols - a.shape[1])))

    # Narrow HBM dtypes: adjacency / features / weights as bf16 (0/1 exact);
    # biases and degree norms stay f32.
    a1 = pad2(adj1, D1_p, S1_p, jnp.bfloat16)
    a2 = pad2(adj2, D2_p, D1_p, jnp.bfloat16)
    xp = pad2(x, S1_p, F_in_p, jnp.bfloat16)
    w1 = pad2(params["w1"], F_in_p, F_h_p, jnp.bfloat16)
    w2 = pad2(params["w2"], F_h_p, F_out_p, jnp.bfloat16)
    b1 = pad2(params["b1"].reshape(1, -1), 1, F_h_p, jnp.float32)
    b2 = pad2(params["b2"].reshape(1, -1), 1, F_out_p, jnp.float32)

    # Source (out-)degree norms: column sums span all dst-row tiles, so they
    # are computed once here (f32, exact) and streamed into the kernel.
    def src_norm(adj, padded_len):
        deg = jnp.sum(adj.astype(jnp.float32), axis=0)
        n = jax.lax.rsqrt(jnp.maximum(deg, 1.0))
        return jnp.pad(n, (0, padded_len - n.shape[0]),
                       constant_values=1.0).reshape(-1, 1)

    sn1 = src_norm(adj1, S1_p)
    sn2 = src_norm(adj2, D1_p)

    # Layer 1 (+ReLU): bf16 output keeps the intermediate narrow for layer 2.
    h = _graphconv_pallas(a1, sn1, xp, w1, b1, tile_d=td1, tile_s=ts1,
                          relu=True, out_dtype=jnp.bfloat16)
    # Padded layer-1 dst rows equal relu(b1); A2's zero-padded columns
    # neutralize them, so the result below is exact w.r.t. the real graph.
    out = _graphconv_pallas(a2, sn2, h, w2, b2, tile_d=td2, tile_s=ts2,
                            relu=False, out_dtype=jnp.float32)
    return out[:D2, :F_out]


def _init_params(key, in_feats, h_feats, num_classes):
    k1, k2 = jax.random.split(key)
    lim1 = (6.0 / (in_feats + h_feats)) ** 0.5
    lim2 = (6.0 / (h_feats + num_classes)) ** 0.5
    return {
        "w1": jax.random.uniform(k1, (in_feats, h_feats), jnp.float32,
                                 -lim1, lim1),
        "b1": jnp.zeros((h_feats,), jnp.float32),
        "w2": jax.random.uniform(k2, (h_feats, num_classes), jnp.float32,
                                 -lim2, lim2),
        "b2": jnp.zeros((num_classes,), jnp.float32),
    }


def _graphconv_ref(adj, x, w, b, relu):
    """Pure-JAX reference (DGL GraphConv, norm='both'), all f32."""
    src_norm = jax.lax.rsqrt(jnp.maximum(jnp.sum(adj, axis=0), 1.0))   # (S,)
    dst_norm = jax.lax.rsqrt(jnp.maximum(jnp.sum(adj, axis=1), 1.0))   # (D,)
    h = adj @ (x * src_norm[:, None])
    h = h @ w
    h = h * dst_norm[:, None] + b[None, :]
    return jnp.maximum(h, 0.0) if relu else h


def _model_ref(params, adj1, adj2, x):
    h = _graphconv_ref(adj1, x, params["w1"], params["b1"], relu=True)
    return _graphconv_ref(adj2, h, params["w2"], params["b2"], relu=False)


if __name__ == "__main__":
    root = jax.random.PRNGKey(0)

    def run_case(name, num_src1, num_dst1, num_dst2, in_feats, h_feats,
                 num_classes, p1, p2, key):
        k_x, k_a1, k_a2, k_p = jax.random.split(key, 4)
        x = jax.random.normal(k_x, (num_src1, in_feats), jnp.float32)
        adj1 = (jax.random.uniform(k_a1, (num_dst1, num_src1)) < p1
                ).astype(jnp.float32)
        adj2 = (jax.random.uniform(k_a2, (num_dst2, num_dst1)) < p2
                ).astype(jnp.float32)
        params = _init_params(k_p, in_feats, h_feats, num_classes)

        out = jax.jit(custom_gnn_model)(params, adj1, adj2, x)
        out = jax.block_until_ready(out)
        assert out.shape == (num_dst2, num_classes), (name, out.shape)

        ref = _model_ref(params, adj1, adj2, x)
        err = float(jnp.max(jnp.abs(out - ref)) / (jnp.max(jnp.abs(ref)) + 1e-6))
        assert err < 0.05, f"{name}: mismatch vs f32 reference, rel-max-err={err}"

    # Small sampler-sized MFG (single-tile grid per layer).
    run_case("small", 64, 32, 16, 16, 32, 8, 0.2, 0.3,
             jax.random.fold_in(root, 0))
    # Medium MFG exercising the tiled (parallel-dst x reduce-src) grid.
    run_case("medium", 1200, 300, 70, 100, 64, 10, 0.05, 0.2,
             jax.random.fold_in(root, 1))

    print("KERNEL_OK")
</pallas_src>

<mosaic_0001>
module attributes {stable_mosaic.version = 11 : i64} {
  func.func @_graphconv_kernel(%arg0: i32, %arg1: i32, %arg2: memref<128x1xf32, #tpu.memory_space<vmem>>, %arg3: memref<128x128xbf16, #tpu.memory_space<vmem>>, %arg4: memref<128x128xbf16, #tpu.memory_space<vmem>>, %arg5: memref<128x128xbf16, #tpu.memory_space<vmem>>, %arg6: memref<1x128xf32, #tpu.memory_space<vmem>>, %arg7: memref<128x128xbf16, #tpu.memory_space<vmem>>, %arg8: memref<128x128xf32, #tpu.memory_space<vmem>>, %arg9: memref<128x1xf32, #tpu.memory_space<vmem>>) attributes {dimension_semantics = [#tpu.dimension_semantics<parallel>, #tpu.dimension_semantics<arbitrary>], iteration_bounds = array<i64: 1, 1>, scalar_prefetch = 0 : i64, scratch_operands = 2 : i64, tpu.core_type = #tpu.core_type<tc>, window_params = [{transform_indices = @transform_0, window_bounds = array<i64: 128, 1>}, {transform_indices = @transform_1, window_bounds = array<i64: 128, 128>}, {transform_indices = @transform_2, window_bounds = array<i64: 128, 128>}, {pipeline_mode = #tpu.pipeline_mode<synchronous>, transform_indices = @transform_3, window_bounds = array<i64: 128, 128>}, {pipeline_mode = #tpu.pipeline_mode<synchronous>, transform_indices = @transform_4, window_bounds = array<i64: 1, 128>}, {transform_indices = @transform_5, window_bounds = array<i64: 128, 128>}]} {
    %c0_i32 = arith.constant 0 : i32
    %0 = arith.cmpi eq, %arg1, %c0_i32 : i32
    %1 = arith.extui %0 : i1 to i32
    %c0_i32_0 = arith.constant 0 : i32
    %2 = arith.cmpi ne, %1, %c0_i32_0 : i32
    scf.if %2 {
      %cst_18 = arith.constant 0.000000e+00 : f32
      %22 = vector.broadcast %cst_18 : f32 to vector<128x128xf32>
      %c0_19 = arith.constant 0 : index
      %c0_20 = arith.constant 0 : index
      %23 = vector.load %arg8[%c0_19, %c0_20] : memref<128x128xf32, #tpu.memory_space<vmem>>, vector<128x128xf32>
      tpu.vector_store %arg8[%c0_19, %c0_20], %22 {strides = array<i32>} : memref<128x128xf32, #tpu.memory_space<vmem>>, vector<128x128xf32>,
      %cst_21 = arith.constant 0.000000e+00 : f32
      %24 = vector.broadcast %cst_21 : f32 to vector<128x1xf32>
      %c0_22 = arith.constant 0 : index
      %c0_23 = arith.constant 0 : index
      %25 = vector.load %arg9[%c0_22, %c0_23] : memref<128x1xf32, #tpu.memory_space<vmem>>, vector<128x1xf32>
      tpu.vector_store %arg9[%c0_22, %c0_23], %24 {strides = array<i32>} : memref<128x1xf32, #tpu.memory_space<vmem>>, vector<128x1xf32>,
    } else {
    }
    %c0 = arith.constant 0 : index
    %c0_1 = arith.constant 0 : index
    %3 = vector.load %arg3[%c0, %c0_1] : memref<128x128xbf16, #tpu.memory_space<vmem>>, vector<128x128xbf16>
    %c0_2 = arith.constant 0 : index
    %c0_3 = arith.constant 0 : index
    %4 = vector.load %arg4[%c0_2, %c0_3] : memref<128x128xbf16, #tpu.memory_space<vmem>>, vector<128x128xbf16>
    %5 = arith.extf %4 : vector<128x128xbf16> to vector<128x128xf32>
    %c0_4 = arith.constant 0 : index
    %c0_5 = arith.constant 0 : index
    %6 = vector.load %arg2[%c0_4, %c0_5] : memref<128x1xf32, #tpu.memory_space<vmem>>, vector<128x1xf32>
    %7 = vector.broadcast %6 : vector<128x1xf32> to vector<128x128xf32>
    %8 = arith.mulf %5, %7 : vector<128x128xf32>
    %9 = arith.truncf %8 : vector<128x128xf32> to vector<128x128xbf16>
    %c0_6 = arith.constant 0 : index
    %c0_7 = arith.constant 0 : index
    %10 = vector.load %arg8[%c0_6, %c0_7] : memref<128x128xf32, #tpu.memory_space<vmem>>, vector<128x128xf32>
    %cst = arith.constant dense<0.000000e+00> : vector<128x128xf32>
    %11 = tpu.matmul %3, %9, %cst {dimension_numbers = #tpu.dot_dimension_numbers<[1], [0], [0], [1], [0, 0, 1, 1], [], []>} : vector<128x128xbf16>, vector<128x128xbf16>, vector<128x128xf32> -> vector<128x128xf32>
    %12 = arith.addf %10, %11 : vector<128x128xf32>
    %c0_8 = arith.constant 0 : index
    %c0_9 = arith.constant 0 : index
    %13 = vector.load %arg8[%c0_8, %c0_9] : memref<128x128xf32, #tpu.memory_space<vmem>>, vector<128x128xf32>
    tpu.vector_store %arg8[%c0_8, %c0_9], %12 {strides = array<i32>} : memref<128x128xf32, #tpu.memory_space<vmem>>, vector<128x128xf32>,
    %cst_10 = arith.constant 1.000000e+00 : bf16
    %14 = vector.broadcast %cst_10 : bf16 to vector<128x1xbf16>
    %c0_11 = arith.constant 0 : index
    %c0_12 = arith.constant 0 : index
    %15 = vector.load %arg9[%c0_11, %c0_12] : memref<128x1xf32, #tpu.memory_space<vmem>>, vector<128x1xf32>
    %cst_13 = arith.constant dense<0.000000e+00> : vector<128x1xf32>
    %16 = tpu.matmul %3, %14, %cst_13 {dimension_numbers = #tpu.dot_dimension_numbers<[1], [0], [0], [1], [0, 0, 1, 1], [], []>} : vector<128x128xbf16>, vector<128x1xbf16>, vector<128x1xf32> -> vector<128x1xf32>
    %17 = arith.addf %15, %16 : vector<128x1xf32>
    %c0_14 = arith.constant 0 : index
    %c0_15 = arith.constant 0 : index
    %18 = vector.load %arg9[%c0_14, %c0_15] : memref<128x1xf32, #tpu.memory_space<vmem>>, vector<128x1xf32>
    tpu.vector_store %arg9[%c0_14, %c0_15], %17 {strides = array<i32>} : memref<128x1xf32, #tpu.memory_space<vmem>>, vector<128x1xf32>,
    %c0_i32_16 = arith.constant 0 : i32
    %19 = arith.cmpi eq, %arg1, %c0_i32_16 : i32
    %20 = arith.extui %19 : i1 to i32
    %c0_i32_17 = arith.constant 0 : i32
    %21 = arith.cmpi ne, %20, %c0_i32_17 : i32
    scf.if %21 {
      %c0_18 = arith.constant 0 : index
      %c0_19 = arith.constant 0 : index
      %22 = vector.load %arg9[%c0_18, %c0_19] : memref<128x1xf32, #tpu.memory_space<vmem>>, vector<128x1xf32>
      %cst_20 = arith.constant 1.000000e+00 : f32
      %23 = vector.broadcast %cst_20 : f32 to vector<128x1xf32>
      %24 = arith.maximumf %22, %23 : vector<128x1xf32>
      %25 = math.rsqrt %24 : vector<128x1xf32>
      %c0_21 = arith.constant 0 : index
      %c0_22 = arith.constant 0 : index
      %26 = vector.load %arg8[%c0_21, %c0_22] : memref<128x128xf32, #tpu.memory_space<vmem>>, vector<128x128xf32>
      %27 = arith.truncf %26 : vector<128x128xf32> to vector<128x128xbf16>
      %c0_23 = arith.constant 0 : index
      %c0_24 = arith.constant 0 : index
      %28 = vector.load %arg5[%c0_23, %c0_24] : memref<128x128xbf16, #tpu.memory_space<vmem>>, vector<128x128xbf16>
      %cst_25 = arith.constant dense<0.000000e+00> : vector<128x128xf32>
      %29 = tpu.matmul %27, %28, %cst_25 {dimension_numbers = #tpu.dot_dimension_numbers<[1], [0], [0], [1], [0, 0, 1, 1], [], []>} : vector<128x128xbf16>, vector<128x128xbf16>, vector<128x128xf32> -> vector<128x128xf32>
      %30 = vector.broadcast %25 : vector<128x1xf32> to vector<128x128xf32>
      %31 = arith.mulf %29, %30 : vector<128x128xf32>
      %c0_26 = arith.constant 0 : index
      %c0_27 = arith.constant 0 : index
      %32 = vector.load %arg6[%c0_26, %c0_27] : memref<1x128xf32, #tpu.memory_space<vmem>>, vector<1x128xf32>
      %33 = vector.broadcast %32 : vector<1x128xf32> to vector<128x128xf32>
      %34 = arith.addf %31, %33 : vector<128x128xf32>
      %cst_28 = arith.constant 0.000000e+00 : f32
      %35 = vector.broadcast %cst_28 : f32 to vector<128x128xf32>
      %36 = arith.maximumf %34, %35 : vector<128x128xf32>
      %37 = arith.truncf %36 : vector<128x128xf32> to vector<128x128xbf16>
      %c0_29 = arith.constant 0 : index
      %c0_30 = arith.constant 0 : index
      %38 = vector.load %arg7[%c0_29, %c0_30] : memref<128x128xbf16, #tpu.memory_space<vmem>>, vector<128x128xbf16>
      tpu.vector_store %arg7[%c0_29, %c0_30], %37 {strides = array<i32>} : memref<128x128xbf16, #tpu.memory_space<vmem>>, vector<128x128xbf16>,
    } else {
    }
    return
  }
  func.func @transform_0(%arg0: i32, %arg1: i32) -> (i32, i32) {
    %c0_i32 = arith.constant 0 : i32
    %c0_i32_0 = arith.constant 0 : i32
    return %arg1, %c0_i32 : i32, i32
  }
  func.func @transform_1(%arg0: i32, %arg1: i32) -> (i32, i32) {
    %c0_i32 = arith.constant 0 : i32
    return %arg0, %arg1 : i32, i32
  }
  func.func @transform_2(%arg0: i32, %arg1: i32) -> (i32, i32) {
    %c0_i32 = arith.constant 0 : i32
    %c0_i32_0 = arith.constant 0 : i32
    return %arg1, %c0_i32 : i32, i32
  }
  func.func @transform_3(%arg0: i32, %arg1: i32) -> (i32, i32) {
    %c0_i32 = arith.constant 0 : i32
    %c0_i32_0 = arith.constant 0 : i32
    %c0_i32_1 = arith.constant 0 : i32
    return %c0_i32, %c0_i32_0 : i32, i32
  }
  func.func @transform_4(%arg0: i32, %arg1: i32) -> (i32, i32) {
    %c0_i32 = arith.constant 0 : i32
    %c0_i32_0 = arith.constant 0 : i32
    %c0_i32_1 = arith.constant 0 : i32
    return %c0_i32, %c0_i32_0 : i32, i32
  }
  func.func @transform_5(%arg0: i32, %arg1: i32) -> (i32, i32) {
    %c0_i32 = arith.constant 0 : i32
    %c0_i32_0 = arith.constant 0 : i32
    return %arg0, %c0_i32 : i32, i32
  }
}

module attributes {stable_mosaic.version = 11 : i64} {
  func.func @_graphconv_kernel(%arg0: i32, %arg1: i32, %arg2: memref<128x1xf32, #tpu.memory_space<vmem>>, %arg3: memref<16x128xbf16, #tpu.memory_space<vmem>>, %arg4: memref<128x128xbf16, #tpu.memory_space<vmem>>, %arg5: memref<128x128xbf16, #tpu.memory_space<vmem>>, %arg6: memref<1x128xf32, #tpu.memory_space<vmem>>, %arg7: memref<16x128xf32, #tpu.memory_space<vmem>>, %arg8: memref<16x128xf32, #tpu.memory_space<vmem>>, %arg9: memref<16x1xf32, #tpu.memory_space<vmem>>) attributes {dimension_semantics = [#tpu.dimension_semantics<parallel>, #tpu.dimension_semantics<arbitrary>], iteration_bounds = array<i64: 1, 1>, scalar_prefetch = 0 : i64, scratch_operands = 2 : i64, tpu.core_type = #tpu.core_type<tc>, window_params = [{transform_indices = @transform_0, window_bounds = array<i64: 128, 1>}, {transform_indices = @transform_1, window_bounds = array<i64: 16, 128>}, {transform_indices = @transform_2, window_bounds = array<i64: 128, 128>}, {pipeline_mode = #tpu.pipeline_mode<synchronous>, transform_indices = @transform_3, window_bounds = array<i64: 128, 128>}, {pipeline_mode = #tpu.pipeline_mode<synchronous>, transform_indices = @transform_4, window_bounds = array<i64: 1, 128>}, {transform_indices = @transform_5, window_bounds = array<i64: 16, 128>}]} {
    %c0_i32 = arith.constant 0 : i32
    %0 = arith.cmpi eq, %arg1, %c0_i32 : i32
    %1 = arith.extui %0 : i1 to i32
    %c0_i32_0 = arith.constant 0 : i32
    %2 = arith.cmpi ne, %1, %c0_i32_0 : i32
    scf.if %2 {
      %cst_18 = arith.constant 0.000000e+00 : f32
      %22 = vector.broadcast %cst_18 : f32 to vector<16x128xf32>
      %c0_19 = arith.constant 0 : index
      %c0_20 = arith.constant 0 : index
      %23 = vector.load %arg8[%c0_19, %c0_20] : memref<16x128xf32, #tpu.memory_space<vmem>>, vector<16x128xf32>
      tpu.vector_store %arg8[%c0_19, %c0_20], %22 {strides = array<i32>} : memref<16x128xf32, #tpu.memory_space<vmem>>, vector<16x128xf32>,
      %cst_21 = arith.constant 0.000000e+00 : f32
      %24 = vector.broadcast %cst_21 : f32 to vector<16x1xf32>
      %c0_22 = arith.constant 0 : index
      %c0_23 = arith.constant 0 : index
      %25 = vector.load %arg9[%c0_22, %c0_23] : memref<16x1xf32, #tpu.memory_space<vmem>>, vector<16x1xf32>
      tpu.vector_store %arg9[%c0_22, %c0_23], %24 {strides = array<i32>} : memref<16x1xf32, #tpu.memory_space<vmem>>, vector<16x1xf32>,
    } else {
    }
    %c0 = arith.constant 0 : index
    %c0_1 = arith.constant 0 : index
    %3 = vector.load %arg3[%c0, %c0_1] : memref<16x128xbf16, #tpu.memory_space<vmem>>, vector<16x128xbf16>
    %c0_2 = arith.constant 0 : index
    %c0_3 = arith.constant 0 : index
    %4 = vector.load %arg4[%c0_2, %c0_3] : memref<128x128xbf16, #tpu.memory_space<vmem>>, vector<128x128xbf16>
    %5 = arith.extf %4 : vector<128x128xbf16> to vector<128x128xf32>
    %c0_4 = arith.constant 0 : index
    %c0_5 = arith.constant 0 : index
    %6 = vector.load %arg2[%c0_4, %c0_5] : memref<128x1xf32, #tpu.memory_space<vmem>>, vector<128x1xf32>
    %7 = vector.broadcast %6 : vector<128x1xf32> to vector<128x128xf32>
    %8 = arith.mulf %5, %7 : vector<128x128xf32>
    %9 = arith.truncf %8 : vector<128x128xf32> to vector<128x128xbf16>
    %c0_6 = arith.constant 0 : index
    %c0_7 = arith.constant 0 : index
    %10 = vector.load %arg8[%c0_6, %c0_7] : memref<16x128xf32, #tpu.memory_space<vmem>>, vector<16x128xf32>
    %cst = arith.constant dense<0.000000e+00> : vector<16x128xf32>
    %11 = tpu.matmul %3, %9, %cst {dimension_numbers = #tpu.dot_dimension_numbers<[1], [0], [0], [1], [0, 0, 1, 1], [], []>} : vector<16x128xbf16>, vector<128x128xbf16>, vector<16x128xf32> -> vector<16x128xf32>
    %12 = arith.addf %10, %11 : vector<16x128xf32>
    %c0_8 = arith.constant 0 : index
    %c0_9 = arith.constant 0 : index
    %13 = vector.load %arg8[%c0_8, %c0_9] : memref<16x128xf32, #tpu.memory_space<vmem>>, vector<16x128xf32>
    tpu.vector_store %arg8[%c0_8, %c0_9], %12 {strides = array<i32>} : memref<16x128xf32, #tpu.memory_space<vmem>>, vector<16x128xf32>,
    %cst_10 = arith.constant 1.000000e+00 : bf16
    %14 = vector.broadcast %cst_10 : bf16 to vector<128x1xbf16>
    %c0_11 = arith.constant 0 : index
    %c0_12 = arith.constant 0 : index
    %15 = vector.load %arg9[%c0_11, %c0_12] : memref<16x1xf32, #tpu.memory_space<vmem>>, vector<16x1xf32>
    %cst_13 = arith.constant dense<0.000000e+00> : vector<16x1xf32>
    %16 = tpu.matmul %3, %14, %cst_13 {dimension_numbers = #tpu.dot_dimension_numbers<[1], [0], [0], [1], [0, 0, 1, 1], [], []>} : vector<16x128xbf16>, vector<128x1xbf16>, vector<16x1xf32> -> vector<16x1xf32>
    %17 = arith.addf %15, %16 : vector<16x1xf32>
    %c0_14 = arith.constant 0 : index
    %c0_15 = arith.constant 0 : index
    %18 = vector.load %arg9[%c0_14, %c0_15] : memref<16x1xf32, #tpu.memory_space<vmem>>, vector<16x1xf32>
    tpu.vector_store %arg9[%c0_14, %c0_15], %17 {strides = array<i32>} : memref<16x1xf32, #tpu.memory_space<vmem>>, vector<16x1xf32>,
    %c0_i32_16 = arith.constant 0 : i32
    %19 = arith.cmpi eq, %arg1, %c0_i32_16 : i32
    %20 = arith.extui %19 : i1 to i32
    %c0_i32_17 = arith.constant 0 : i32
    %21 = arith.cmpi ne, %20, %c0_i32_17 : i32
    scf.if %21 {
      %c0_18 = arith.constant 0 : index
      %c0_19 = arith.constant 0 : index
      %22 = vector.load %arg9[%c0_18, %c0_19] : memref<16x1xf32, #tpu.memory_space<vmem>>, vector<16x1xf32>
      %cst_20 = arith.constant 1.000000e+00 : f32
      %23 = vector.broadcast %cst_20 : f32 to vector<16x1xf32>
      %24 = arith.maximumf %22, %23 : vector<16x1xf32>
      %25 = math.rsqrt %24 : vector<16x1xf32>
      %c0_21 = arith.constant 0 : index
      %c0_22 = arith.constant 0 : index
      %26 = vector.load %arg8[%c0_21, %c0_22] : memref<16x128xf32, #tpu.memory_space<vmem>>, vector<16x128xf32>
      %27 = arith.truncf %26 : vector<16x128xf32> to vector<16x128xbf16>
      %c0_23 = arith.constant 0 : index
      %c0_24 = arith.constant 0 : index
      %28 = vector.load %arg5[%c0_23, %c0_24] : memref<128x128xbf16, #tpu.memory_space<vmem>>, vector<128x128xbf16>
      %cst_25 = arith.constant dense<0.000000e+00> : vector<16x128xf32>
      %29 = tpu.matmul %27, %28, %cst_25 {dimension_numbers = #tpu.dot_dimension_numbers<[1], [0], [0], [1], [0, 0, 1, 1], [], []>} : vector<16x128xbf16>, vector<128x128xbf16>, vector<16x128xf32> -> vector<16x128xf32>
      %30 = vector.broadcast %25 : vector<16x1xf32> to vector<16x128xf32>
      %31 = arith.mulf %29, %30 : vector<16x128xf32>
      %c0_26 = arith.constant 0 : index
      %c0_27 = arith.constant 0 : index
      %32 = vector.load %arg6[%c0_26, %c0_27] : memref<1x128xf32, #tpu.memory_space<vmem>>, vector<1x128xf32>
      %33 = vector.broadcast %32 : vector<1x128xf32> to vector<16x128xf32>
      %34 = arith.addf %31, %33 : vector<16x128xf32>
      %c0_28 = arith.constant 0 : index
      %c0_29 = arith.constant 0 : index
      %35 = vector.load %arg7[%c0_28, %c0_29] : memref<16x128xf32, #tpu.memory_space<vmem>>, vector<16x128xf32>
      tpu.vector_store %arg7[%c0_28, %c0_29], %34 {strides = array<i32>} : memref<16x128xf32, #tpu.memory_space<vmem>>, vector<16x128xf32>,
    } else {
    }
    return
  }
  func.func @transform_0(%arg0: i32, %arg1: i32) -> (i32, i32) {
    %c0_i32 = arith.constant 0 : i32
    %c0_i32_0 = arith.constant 0 : i32
    return %arg1, %c0_i32 : i32, i32
  }
  func.func @transform_1(%arg0: i32, %arg1: i32) -> (i32, i32) {
    %c0_i32 = arith.constant 0 : i32
    return %arg0, %arg1 : i32, i32
  }
  func.func @transform_2(%arg0: i32, %arg1: i32) -> (i32, i32) {
    %c0_i32 = arith.constant 0 : i32
    %c0_i32_0 = arith.constant 0 : i32
    return %arg1, %c0_i32 : i32, i32
  }
  func.func @transform_3(%arg0: i32, %arg1: i32) -> (i32, i32) {
    %c0_i32 = arith.constant 0 : i32
    %c0_i32_0 = arith.constant 0 : i32
    %c0_i32_1 = arith.constant 0 : i32
    return %c0_i32, %c0_i32_0 : i32, i32
  }
  func.func @transform_4(%arg0: i32, %arg1: i32) -> (i32, i32) {
    %c0_i32 = arith.constant 0 : i32
    %c0_i32_0 = arith.constant 0 : i32
    %c0_i32_1 = arith.constant 0 : i32
    return %c0_i32, %c0_i32_0 : i32, i32
  }
  func.func @transform_5(%arg0: i32, %arg1: i32) -> (i32, i32) {
    %c0_i32 = arith.constant 0 : i32
    %c0_i32_0 = arith.constant 0 : i32
    return %arg0, %c0_i32 : i32, i32
  }
}

</mosaic_0001>

<bundles_post_ra>
// kernel: custom_gnn_model.3
= control target key start
LH: loop header
LB: loop body
LE: loop exit
PB: predicated region body
PF: predicated region fallthrough
CT: control target
= control target key end

     0   :  { %v458_v0 = vmov 1065369472   ;;  %v459_v1 = vmov 0   ;;  %vm27_vm0 = vcmask 7168   ;;  %v460_v23 = vmov 0.0   ;;  %s607_s0 = inlined_call_operand.vmem [shape: f32[128,1], index: 0, kind: input, shape index: {}]   ;;  %s608_s1 = inlined_call_operand.vmem [shape: bf16[16,128], index: 1, kind: input, shape index: {}]   ;;  %s609_s2 = inlined_call_operand.vmem [shape: bf16[128,128], index: 2, kind: input, shape index: {}]   ;;  %s610_s3 = inlined_call_operand.vmem [shape: bf16[128,128], index: 3, kind: input, shape index: {}]   ;;  %s611_s4 = inlined_call_operand.vmem [shape: f32[1,128], index: 4, kind: input, shape index: {}]   ;;  %s612_s5 = inlined_call_operand.vmem [shape: f32[16,128], index: 5, kind: output, shape index: {}]  }
   0x1   :  { %212 = vmatpush.bf16.msra.mxu1 %v458_v0  ;;  %452 = vset.pattern.permute.xlu2 %v459_v1  ;;  %v78_v2 = vld [vmem:[%s607_s0 + $0x70] sm:$0xff]  ;;  %v76_v3 = vld [vmem:[%s607_s0 + $0x60] sm:$0xff]  ;;  %v79_v5 = vld [vmem:[%s607_s0 + $0x78] sm:$0xff]  ;;  %28 = vst.msk [vmem:[#allocation3] sm:$0xff] %vm27_vm0, %v460_v23 }
   0x2   :  { %v74_v4 = vld [vmem:[%s607_s0 + $0x50] sm:$0xff]  ;;  %451 = vset.pattern.permute.xlu1 %v459_v1  ;;  %450 = vset.pattern.permute.xlu0 %v459_v1  ;;  %v77_v6 = vld [vmem:[%s607_s0 + $0x68] sm:$0xff]  ;;  %v75_v7 = vld [vmem:[%s607_s0 + $0x58] sm:$0xff]  ;;  %29 = vst.msk [vmem:[#allocation3 + $0x8] sm:$0xff] %vm27_vm0, %v460_v23 }
   0x3   :  { %152 = vperm.xlu0 %450, %v78_v2   ;;  %142 = vperm.xlu1 %451, %v76_v3   ;;  %v73_v8 = vld [vmem:[%s607_s0 + $0x48] sm:$0xff]  ;;  %v72_v9 = vld [vmem:[%s607_s0 + $0x40] sm:$0xff]  ;;  %v70_v10 = vld [vmem:[%s607_s0 + $0x30] sm:$0xff] }
   0x4   :  { %132 = vperm.xlu2 %452, %v74_v4   ;;  %v71_v11 = vld [vmem:[%s607_s0 + $0x38] sm:$0xff]  ;;  %v68_v12 = vld [vmem:[%s607_s0 + $0x20] sm:$0xff]  ;;  %v69_v13 = vld [vmem:[%s607_s0 + $0x28] sm:$0xff] }
   0x5   :  { %213 = vmatpush.bf16.msra.mxu1 %v458_v0  ;;  %v530_v14 = vld [vmem:[%s608_s1] sm:$0xff]  ;;  %v67_v15 = vld [vmem:[%s607_s0 + $0x18] sm:$0xff]  ;;  %v66_v16 = vld [vmem:[%s607_s0 + $0x10] sm:$0xff] }
   0x6   :  { %v64_v17 = vld [vmem:[%s607_s0] sm:$0xff]  ;;  %v65_v18 = vld [vmem:[%s607_s0 + $0x8] sm:$0xff]  ;;  %v446_v22 = vld [vmem:[%s609_s2 + $0x38] sm:$0xff]  }
   0x7   :  { %v438_v24 = vunpack.c.l.bf16 %v446_v22  ;;  %v439_v25 = vunpack.c.h.bf16 %v446_v22  ;;  %v445_v26 = vld [vmem:[%s609_s2 + $0x30] sm:$0xff]   ;;  %v444_v27 = vld [vmem:[%s609_s2 + $0x28] sm:$0xff]   ;;  %v443_v39 = vld [vmem:[%s609_s2 + $0x20] sm:$0xff]  }
   0x8   :  { %v435_v29 = vunpack.c.h.bf16 %v445_v26  ;;  %v434_v33 = vunpack.c.l.bf16 %v445_v26  ;;  %v430_v35 = vunpack.c.l.bf16 %v444_v27  ;;  %v431_v36 = vunpack.c.h.bf16 %v444_v27  ;;  %v442_v48 = vld [vmem:[%s609_s2 + $0x18] sm:$0xff]   ;;  %v441_v55 = vld [vmem:[%s609_s2 + $0x10] sm:$0xff]   ;;  %v440_v63 = vld [vmem:[%s609_s2 + $0x8] sm:$0xff]  }
   0x9   :  { %214 = vmatpush.bf16.msra.mxu1 %v458_v0  ;;  %v427_v43 = vunpack.c.h.bf16 %v443_v39  ;;  %v426_v44 = vunpack.c.l.bf16 %v443_v39  ;;  %v422_v53 = vunpack.c.l.bf16 %v442_v48  ;;  %v423_v54 = vunpack.c.h.bf16 %v442_v48 }
   0xa   :  { %v418_v56 = vunpack.c.l.bf16 %v441_v55  ;;  %v419_v61 = vunpack.c.h.bf16 %v441_v55  ;;  %v415_v4 = vunpack.c.h.bf16 %v440_v63  ;;  %v453_v55 = vld [vmem:[%s611_s4] ss:$0 sm:$0xff] }
   0xb   :  { %157 = vperm.xlu0 %450, %v79_v5   ;;  %147 = vperm.xlu1 %451, %v77_v6   ;;  %v414_v5 = vunpack.c.l.bf16 %v440_v63 }
   0xc   :  { %137 = vperm.xlu2 %452, %v75_v7  }
   0xd   :  { %215 = vmatpush.bf16.msra.mxu1 %v458_v0 }
  0x11   :  { %216 = vmatpush.bf16.msra.mxu1 %v458_v0 }
  0x13   :  { %127 = vperm.xlu1 %451, %v73_v8   ;;  %122 = vperm.xlu0 %450, %v72_v9  }
  0x14   :  { %112 = vperm.xlu2 %452, %v70_v10  }
  0x15   :  { %217 = vmatpush.bf16.msra.mxu1 %v458_v0 }
  0x19   :  { %218 = vmatpush.bf16.msra.mxu1 %v458_v0 }
  0x1b   :  { %117 = vperm.xlu0 %450, %v71_v11   ;;  %102 = vperm.xlu1 %451, %v68_v12   ;;  %v409_v11 = vld [vmem:[%s609_s2] sm:$0xff]  }
  0x1c   :  { %107 = vperm.xlu2 %452, %v69_v13   ;;  %v410_v13 = vunpack.c.l.bf16 %v409_v11 }
  0x1d   :  { %219 = vmatpush.bf16.msra.mxu1 %v458_v0 }
  0x20   :  { %220 = vmatmul.bf16.vlgmr.msra.gmra.mxu1 %v530_v14 }
  0x23   :  { %97 = vperm.xlu1 %451, %v67_v15   ;;  %92 = vperm.xlu0 %450, %v66_v16   ;;  %v411_v15 = vunpack.c.h.bf16 %v409_v11 }
  0x24   :  { %82 = vperm.xlu2 %452, %v64_v17   ;;  %v210_v17 = vld [vmem:[#allocation3] sm:$0xff] }
  0x2b   :  { %87 = vperm.xlu0 %450, %v65_v18  }
  0x5e   :  { %v133_v19 = vpop.permute.xlu2 %132 }
  0x5f   :  { %v170_v41 = vmul.f32 %v430_v35, %v133_v19 }
  0x66   :  { %v138_v28 = vpop.permute.xlu2 %137 }
  0x67   :  { %v171_v42 = vmul.f32 %v431_v36, %v138_v28  ;;  %v406_v28 = vld [vmem:[%s610_s3 + $0x30] sm:$0xff]  ;;  %v403_v36 = vld [vmem:[%s610_s3 + $0x18] sm:$0xff] }
  0x69   :  { %v181_v52 = vpack.c.bf16 %v171_v42, %v170_v41 }
  0x6e   :  { %v113_v49 = vpop.permute.xlu2 %112 }
  0x6f   :  { %v166_v60 = vmul.f32 %v422_v53, %v113_v49  ;;  %v402_v49 = vld [vmem:[%s610_s3 + $0x10] sm:$0xff] }
  0x75   :  { %v153_v20 = vpop.permute.xlu0 %152  ;;  %v143_v21 = vpop.permute.xlu1 %142 }
  0x76   :  { %v174_v32 = vmul.f32 %v438_v24, %v153_v20  ;;  %v172_v40 = vmul.f32 %v434_v33, %v143_v21  ;;  %v108_v2 = vpop.permute.xlu2 %107  ;;  %v211_v24 = vld [vmem:[#allocation3 + $0x8] sm:$0xff] }
  0x77   :  { %v165_v3 = vmul.f32 %v419_v61, %v108_v2 }
  0x7d   :  { %v158_v30 = vpop.permute.xlu0 %157  ;;  %v148_v31 = vpop.permute.xlu1 %147 }
  0x7e   :  { %v175_v34 = vmul.f32 %v439_v25, %v158_v30  ;;  %v173_v37 = vmul.f32 %v435_v29, %v148_v31  ;;  %v83_v16 = vpop.permute.xlu2 %82  ;;  %v407_v25 = vld [vmem:[%s610_s3 + $0x38] sm:$0xff]  ;;  %v405_v31 = vld [vmem:[%s610_s3 + $0x28] sm:$0xff] }
  0x7f   :  { %v160_v20 = vmul.f32 %v410_v13, %v83_v16  ;;  %325 = vmatpush.bf16.msra.mxu2 %v407_v25 }
  0x80   :  { %v183_v38 = vpack.c.bf16 %v175_v34, %v174_v32  ;;  %v182_v45 = vpack.c.bf16 %v173_v37, %v172_v40 }
  0x82   :  { %192 = vmatpush.bf16.msra.mxu0 %v183_v38 }
  0x83   :  { %326 = vmatpush.bf16.msra.mxu2 %v406_v28 }
  0x85   :  { %v128_v46 = vpop.permute.xlu1 %127  ;;  %v123_v47 = vpop.permute.xlu0 %122 }
  0x86   :  { %193 = vmatpush.bf16.msra.mxu0 %v182_v45  ;;  %v169_v50 = vmul.f32 %v427_v43, %v128_v46  ;;  %v168_v51 = vmul.f32 %v426_v44, %v123_v47 }
  0x87   :  { %327 = vmatpush.bf16.msra.mxu2 %v405_v31 }
  0x88   :  { %v180_v57 = vpack.c.bf16 %v169_v50, %v168_v51  ;;  %v401_v50 = vld [vmem:[%s610_s3 + $0x8] sm:$0xff]  ;;  %v400_v51 = vld [vmem:[%s610_s3] sm:$0xff] }
  0x8a   :  { %194 = vmatpush.bf16.msra.mxu0 %v181_v52 }
  0x8d   :  { %v118_v58 = vpop.permute.xlu0 %117  ;;  %v103_v59 = vpop.permute.xlu1 %102 }
  0x8e   :  { %v167_v62 = vmul.f32 %v423_v54, %v118_v58  ;;  %195 = vmatpush.bf16.msra.mxu0 %v180_v57  ;;  %v164_v0 = vmul.f32 %v418_v56, %v103_v59 }
  0x90   :  { %v179_v1 = vpack.c.bf16 %v167_v62, %v166_v60  ;;  %v178_v6 = vpack.c.bf16 %v165_v3, %v164_v0 }
  0x92   :  { %196 = vmatpush.bf16.msra.mxu0 %v179_v1 }
  0x95   :  { %v98_v7 = vpop.permute.xlu1 %97  ;;  %v93_v8 = vpop.permute.xlu0 %92 }
  0x96   :  { %v163_v9 = vmul.f32 %v415_v4, %v98_v7  ;;  %v162_v10 = vmul.f32 %v414_v5, %v93_v8  ;;  %197 = vmatpush.bf16.msra.mxu0 %v178_v6 }
  0x98   :  { %v177_v12 = vpack.c.bf16 %v163_v9, %v162_v10 }
  0x9a   :  { %198 = vmatpush.bf16.msra.mxu0 %v177_v12 }
  0x9d   :  { %v88_v18 = vpop.permute.xlu0 %87  ;;  %v221_v19 = vpop.f32.mrf.mxu1 }
  0x9e   :  { %v161_v21 = vmul.f32 %v411_v15, %v88_v18  ;;  %v226_v22 = vadd.f32 %v221_v19, %v210_v17 }
  0xa0   :  { %229 = vst.msk [vmem:[#allocation3] sm:$0xff] %vm27_vm0, %v226_v22  ;;  %v176_v23 = vpack.c.bf16 %v161_v21, %v160_v20 }
  0xa2   :  { %199 = vmatpush.bf16.msra.mxu0 %v176_v23 }
  0xa5   :  { %200 = vmatmul.bf16.vlgmr.msra.gmra.mxu0 %v530_v14  ;;  %v223_v26 = vpop.f32.mrf.mxu1  ;;  %v404_v14 = vld [vmem:[%s610_s3 + $0x20] sm:$0xff] }
  0xa6   :  { %v227_v27 = vadd.f32 %v223_v26, %v211_v24  ;;  %328 = vmatpush.bf16.msra.mxu2 %v404_v14 }
  0xa7   :  { %v234_v29 = vld [vmem:[#allocation3] sm:$0xff] }
  0xa8   :  { %230 = vst.msk [vmem:[#allocation3 + $0x8] sm:$0xff] %vm27_vm0, %v227_v27  ;;  %v236_v30 = vmax.f32 %v234_v29, 1.0 }
  0xaa   :  { %454 = vrsqrt.f32 %v236_v30  ;;  %vm244_vm1 = vweird.f32 %v236_v30  ;;  %329 = vmatpush.bf16.msra.mxu2 %v403_v36 }
  0xae   :  { %330 = vmatpush.bf16.msra.mxu2 %v402_v49 }
  0xaf   :  { %v235_v32 = vld [vmem:[#allocation3 + $0x8] sm:$0xff] }
  0xb0   :  { %v455_v33 = vpop.eup %454  ;;  %v237_v34 = vmax.f32 %v235_v32, 1.0 }
  0xb1   :  { %v239_v35 = vmul.f32 %v455_v33, %v236_v30  ;;  %vm245_vm2 = vweird.f32 %v455_v33 }
  0xb2   :  { %456 = vrsqrt.f32 %v237_v34  ;;  %vm246_vm3 = vmor %vm244_vm1, %vm245_vm2  ;;  %vm254_vm4 = vweird.f32 %v237_v34  ;;  %331 = vmatpush.bf16.msra.mxu2 %v401_v50 }
  0xb3   :  { %v240_v37 = vmul.f32 %v455_v33, %v239_v35 }
  0xb5   :  { %v241_v38 = vmul.f32 0.5, %v240_v37 }
  0xb6   :  { %332 = vmatpush.bf16.msra.mxu2 %v400_v51 }
  0xb7   :  { %v242_v39 = vsub.f32 1.5, %v241_v38 }
  0xb8   :  { %v457_v40 = vpop.eup %456 }
  0xb9   :  { %v243_v41 = vmul.f32 %v455_v33, %v242_v39  ;;  %v249_v42 = vmul.f32 %v457_v40, %v237_v34  ;;  %vm255_vm5 = vweird.f32 %v457_v40 }
  0xba   :  { %vm256_vm6 = vmor %vm254_vm4, %vm255_vm5 }
  0xbb   :  { %v247_v43 = vsel %vm246_vm3, %v455_v33, %v243_v41  ;;  %v250_v44 = vmul.f32 %v457_v40, %v249_v42 }
  0xbc   :  { %341 = vperm.xlu1 %451, %v247_v43  }
  0xbd   :  { %v251_v45 = vmul.f32 0.5, %v250_v44 }
  0xbf   :  { %v252_v46 = vsub.f32 1.5, %v251_v45 }
  0xc1   :  { %v253_v47 = vmul.f32 %v457_v40, %v252_v46 }
  0xc3   :  { %v257_v48 = vsel %vm256_vm6, %v457_v40, %v253_v47 }
  0xc4   :  { %346 = vperm.xlu2 %452, %v257_v48  }
 0x11e   :  { %v347_v60 = vpop.permute.xlu2 %346 }
 0x122   :  { %v201_v52 = vpop.f32.mrf.mxu0 }
 0x12a   :  { %v203_v53 = vpop.f32.mrf.mxu0 }
 0x12b   :  { %v260_v54 = vpack.c.bf16 %v203_v53, %v201_v52 }
 0x12d   :  { %333 = vmatmul.bf16.vlgmr.msra.gmra.mxu2 %v260_v54 }
 0x12e   :  { %v342_v56 = vpop.permute.xlu1 %341 }
 0x1b0   :  { %v334_v57 = vpop.f32.mrf.mxu2 }
 0x1b1   :  { %v349_v58 = vmul.f32 %v342_v56, %v334_v57 }
 0x1b3   :  { %v355_v59 = vadd.f32 %v453_v55, %v349_v58 }
 0x1b5   :  { %357 = vst [vmem:[%s612_s5] sm:$0xff] %v355_v59 }
 0x1b8   :  { %v336_v61 = vpop.f32.mrf.mxu2 }
 0x1b9   :  { %v350_v62 = vmul.f32 %v347_v60, %v336_v61 }
 0x1bb   :  { %v356_v63 = vadd.f32 %v453_v55, %v350_v62 }
 0x1bd   :  { %358 = vst [vmem:[%s612_s5 + $0x8] sm:$0xff] %v356_v63 }

// kernel: custom_gnn_model.2
= control target key start
LH: loop header
LB: loop body
LE: loop exit
PB: predicated region body
PF: predicated region fallthrough
CT: control target
= control target key end

     0   :  { %v1198_v0 = vmov 1065369472   ;;  %v1199_v1 = vmov 0   ;;  %vm41_vm0 = vcmask 7168   ;;  %v1200_v28 = vmov 0.0   ;;  %s1479_s0 = inlined_call_operand.vmem [shape: f32[128,1], index: 0, kind: input, shape index: {}]   ;;  %s1480_s1 = inlined_call_operand.vmem [shape: bf16[128,128], index: 1, kind: input, shape index: {}]   ;;  %s1481_s2 = inlined_call_operand.vmem [shape: bf16[128,128], index: 2, kind: input, shape index: {}]   ;;  %s1482_s3 = inlined_call_operand.vmem [shape: bf16[128,128], index: 3, kind: input, shape index: {}]   ;;  %s1483_s4 = inlined_call_operand.vmem [shape: f32[1,128], index: 4, kind: input, shape index: {}]   ;;  %s1484_s5 = inlined_call_operand.vmem [shape: bf16[128,128], index: 5, kind: output, shape index: {}]  }
   0x1   :  { %387 = vmatpush.bf16.msra.mxu1 %v1198_v0  ;;  %1164 = vset.pattern.permute.xlu2 %v1199_v1  ;;  %v120_v2 = vld [vmem:[%s1479_s0 + $0x70] sm:$0xff]  ;;  %v118_v3 = vld [vmem:[%s1479_s0 + $0x60] sm:$0xff]  ;;  %v121_v5 = vld [vmem:[%s1479_s0 + $0x78] sm:$0xff]  ;;  %42 = vst.msk [vmem:[#allocation3] sm:$0xff] %vm41_vm0, %v1200_v28 }
   0x2   :  { %v116_v4 = vld [vmem:[%s1479_s0 + $0x50] sm:$0xff]  ;;  %1163 = vset.pattern.permute.xlu1 %v1199_v1  ;;  %1162 = vset.pattern.permute.xlu0 %v1199_v1  ;;  %v119_v6 = vld [vmem:[%s1479_s0 + $0x68] sm:$0xff]  ;;  %v117_v7 = vld [vmem:[%s1479_s0 + $0x58] sm:$0xff]  ;;  %43 = vst.msk [vmem:[#allocation3 + $0x8] sm:$0xff] %vm41_vm0, %v1200_v28 }
   0x3   :  { %194 = vperm.xlu0 %1162, %v120_v2   ;;  %184 = vperm.xlu1 %1163, %v118_v3   ;;  %v115_v8 = vld [vmem:[%s1479_s0 + $0x48] sm:$0xff]  ;;  %v114_v9 = vld [vmem:[%s1479_s0 + $0x40] sm:$0xff]  ;;  %v112_v10 = vld [vmem:[%s1479_s0 + $0x30] sm:$0xff]  ;;  %44 = vst.msk [vmem:[#allocation3 + $0x10] sm:$0xff] %vm41_vm0, %v1200_v28 }
   0x4   :  { %174 = vperm.xlu2 %1164, %v116_v4   ;;  %v113_v11 = vld [vmem:[%s1479_s0 + $0x38] sm:$0xff]  ;;  %v110_v12 = vld [vmem:[%s1479_s0 + $0x20] sm:$0xff]  ;;  %v111_v13 = vld [vmem:[%s1479_s0 + $0x28] sm:$0xff]  ;;  %45 = vst.msk [vmem:[#allocation3 + $0x18] sm:$0xff] %vm41_vm0, %v1200_v28 }
   0x5   :  { %388 = vmatpush.bf16.msra.mxu1 %v1198_v0  ;;  %v1277_v14 = vld [vmem:[%s1480_s1] sm:$0xff]  ;;  %v109_v15 = vld [vmem:[%s1479_s0 + $0x18] sm:$0xff]  ;;  %v108_v16 = vld [vmem:[%s1479_s0 + $0x10] sm:$0xff]  ;;  %46 = vst.msk [vmem:[#allocation3 + $0x20] sm:$0xff] %vm41_vm0, %v1200_v28 }
   0x6   :  { %v106_v17 = vld [vmem:[%s1479_s0] sm:$0xff]  ;;  %v107_v18 = vld [vmem:[%s1479_s0 + $0x8] sm:$0xff]  ;;  %v1302_v20 = vld [vmem:[%s1480_s1 + $0x10] sm:$0xff]  ;;  %47 = vst.msk [vmem:[#allocation3 + $0x28] sm:$0xff] %vm41_vm0, %v1200_v28 }
   0x7   :  { %v1296_v19 = vld [vmem:[%s1480_s1 + $0x8] sm:$0xff]  ;;  %v1308_v21 = vld [vmem:[%s1480_s1 + $0x18] sm:$0xff]  ;;  %v1314_v22 = vld [vmem:[%s1480_s1 + $0x20] sm:$0xff]  ;;  %48 = vst.msk [vmem:[#allocation3 + $0x30] sm:$0xff] %vm41_vm0, %v1200_v28 }
   0x8   :  { %v1320_v23 = vld [vmem:[%s1480_s1 + $0x28] sm:$0xff]  ;;  %v1127_v27 = vld [vmem:[%s1481_s2 + $0x38] sm:$0xff]   ;;  %v1126_v31 = vld [vmem:[%s1481_s2 + $0x30] sm:$0xff]   ;;  %49 = vst.msk [vmem:[#allocation3 + $0x38] sm:$0xff] %vm41_vm0, %v1200_v28 }
   0x9   :  { %389 = vmatpush.bf16.msra.mxu1 %v1198_v0  ;;  %v1079_v29 = vunpack.c.l.bf16 %v1127_v27  ;;  %v1080_v30 = vunpack.c.h.bf16 %v1127_v27  ;;  %v1125_v32 = vld [vmem:[%s1481_s2 + $0x28] sm:$0xff]   ;;  %v1076_v34 = vunpack.c.h.bf16 %v1126_v31  ;;  %v1075_v38 = vunpack.c.l.bf16 %v1126_v31  ;;  %50 = vst.msk [vmem:[#allocation3 + $0x40] sm:$0xff] %vm41_vm0, %v1200_v28  ;;  %v1124_v44 = vld [vmem:[%s1481_s2 + $0x20] sm:$0xff]   ;;  %v1123_v53 = vld [vmem:[%s1481_s2 + $0x18] sm:$0xff]  }
   0xa   :  { %v1071_v40 = vunpack.c.l.bf16 %v1125_v32  ;;  %v1072_v41 = vunpack.c.h.bf16 %v1125_v32  ;;  %51 = vst.msk [vmem:[#allocation3 + $0x48] sm:$0xff] %vm41_vm0, %v1200_v28  ;;  %v1068_v48 = vunpack.c.h.bf16 %v1124_v44  ;;  %v1067_v49 = vunpack.c.l.bf16 %v1124_v44  ;;  %v1122_v60 = vld [vmem:[%s1481_s2 + $0x10] sm:$0xff]  }
   0xb   :  { %199 = vperm.xlu0 %1162, %v121_v5   ;;  %189 = vperm.xlu1 %1163, %v119_v6   ;;  %52 = vst.msk [vmem:[#allocation3 + $0x50] sm:$0xff] %vm41_vm0, %v1200_v28  ;;  %v1063_v58 = vunpack.c.l.bf16 %v1123_v53  ;;  %v1064_v59 = vunpack.c.h.bf16 %v1123_v53  ;;  %v1059_v61 = vunpack.c.l.bf16 %v1122_v60  ;;  %v1060_v3 = vunpack.c.h.bf16 %v1122_v60  ;;  %v1121_v5 = vld [vmem:[%s1481_s2 + $0x8] sm:$0xff]  }
   0xc   :  { %179 = vperm.xlu2 %1164, %v117_v7   ;;  %53 = vst.msk [vmem:[#allocation3 + $0x58] sm:$0xff] %vm41_vm0, %v1200_v28 }
   0xd   :  { %390 = vmatpush.bf16.msra.mxu1 %v1198_v0  ;;  %54 = vst.msk [vmem:[#allocation3 + $0x60] sm:$0xff] %vm41_vm0, %v1200_v28 }
   0xe   :  { %55 = vst.msk [vmem:[#allocation3 + $0x68] sm:$0xff] %vm41_vm0, %v1200_v28 }
   0xf   :  { %56 = vst.msk [vmem:[#allocation3 + $0x70] sm:$0xff] %vm41_vm0, %v1200_v28 }
  0x10   :  { %57 = vst.msk [vmem:[#allocation3 + $0x78] sm:$0xff] %vm41_vm0, %v1200_v28  ;;  %v371_v28 = vld [vmem:[#allocation3] sm:$0xff] }
  0x11   :  { %391 = vmatpush.bf16.msra.mxu1 %v1198_v0 }
  0x13   :  { %169 = vperm.xlu1 %1163, %v115_v8   ;;  %164 = vperm.xlu0 %1162, %v114_v9  }
  0x14   :  { %154 = vperm.xlu2 %1164, %v112_v10   ;;  %v1056_v10 = vunpack.c.h.bf16 %v1121_v5 }
  0x15   :  { %392 = vmatpush.bf16.msra.mxu1 %v1198_v0 }
  0x19   :  { %393 = vmatpush.bf16.msra.mxu1 %v1198_v0 }
  0x1b   :  { %159 = vperm.xlu0 %1162, %v113_v11   ;;  %144 = vperm.xlu1 %1163, %v110_v12   ;;  %v1055_v11 = vunpack.c.l.bf16 %v1121_v5 }
  0x1c   :  { %149 = vperm.xlu2 %1164, %v111_v13  }
  0x1d   :  { %394 = vmatpush.bf16.msra.mxu1 %v1198_v0 }
  0x20   :  { %395 = vmatmul.bf16.vlgmr.msra.gmra.mxu1 %v1277_v14 }
  0x23   :  { %139 = vperm.xlu1 %1163, %v109_v15   ;;  %134 = vperm.xlu0 %1162, %v108_v16  }
  0x24   :  { %124 = vperm.xlu2 %1164, %v106_v17  }
  0x2b   :  { %129 = vperm.xlu0 %1162, %v107_v18   ;;  %v1050_v18 = vld [vmem:[%s1481_s2] sm:$0xff]  }
  0x30   :  { %400 = vmatmul.bf16.gmra.mxu1 %v1296_v19 }
  0x40   :  { %405 = vmatmul.bf16.gmra.mxu1 %v1302_v20 }
  0x50   :  { %410 = vmatmul.bf16.gmra.mxu1 %v1308_v21 }
  0x5e   :  { %v175_v24 = vpop.permute.xlu2 %174 }
  0x5f   :  { %v212_v46 = vmul.f32 %v1071_v40, %v175_v24 }
  0x60   :  { %415 = vmatmul.bf16.gmra.mxu1 %v1314_v22 }
  0x66   :  { %v180_v33 = vpop.permute.xlu2 %179 }
  0x67   :  { %v213_v47 = vmul.f32 %v1072_v41, %v180_v33  ;;  %v373_v41 = vld [vmem:[#allocation3 + $0x10] sm:$0xff] }
  0x69   :  { %v223_v57 = vpack.c.bf16 %v213_v47, %v212_v46  ;;  %v1380_v46 = vld [vmem:[%s1480_s1 + $0x38] sm:$0xff] }
  0x6e   :  { %v155_v54 = vpop.permute.xlu2 %154 }
  0x6f   :  { %v208_v2 = vmul.f32 %v1063_v58, %v155_v54 }
  0x70   :  { %420 = vmatmul.bf16.gmra.mxu1 %v1320_v23 }
  0x75   :  { %v195_v25 = vpop.permute.xlu0 %194  ;;  %v185_v26 = vpop.permute.xlu1 %184 }
  0x76   :  { %v216_v37 = vmul.f32 %v1079_v29, %v195_v25  ;;  %v214_v45 = vmul.f32 %v1075_v38, %v185_v26  ;;  %v150_v8 = vpop.permute.xlu2 %149  ;;  %v1051_v25 = vunpack.c.l.bf16 %v1050_v18  ;;  %v1052_v26 = vunpack.c.h.bf16 %v1050_v18 }
  0x77   :  { %v207_v9 = vmul.f32 %v1060_v3, %v150_v8  ;;  %v376_v8 = vld [vmem:[#allocation3 + $0x28] sm:$0xff] }
  0x7d   :  { %v200_v35 = vpop.permute.xlu0 %199  ;;  %v190_v36 = vpop.permute.xlu1 %189 }
  0x7e   :  { %v217_v39 = vmul.f32 %v1080_v30, %v200_v35  ;;  %v215_v42 = vmul.f32 %v1076_v34, %v190_v36  ;;  %v125_v27 = vpop.permute.xlu2 %124  ;;  %v1367_v35 = vld [vmem:[%s1480_s1 + $0x30] sm:$0xff]  ;;  %v372_v36 = vld [vmem:[#allocation3 + $0x8] sm:$0xff] }
  0x7f   :  { %v202_v31 = vmul.f32 %v1051_v25, %v125_v27  ;;  %v377_v25 = vld [vmem:[#allocation3 + $0x30] sm:$0xff] }
  0x80   :  { %v225_v43 = vpack.c.bf16 %v217_v39, %v216_v37  ;;  %v224_v50 = vpack.c.bf16 %v215_v42, %v214_v45 }
  0x82   :  { %290 = vmatpush.bf16.msra.mxu0 %v225_v43  ;;  %1135 = vmatpush.bf16.msra.mxu3 %v225_v43 }
  0x85   :  { %v170_v51 = vpop.permute.xlu1 %169  ;;  %v165_v52 = vpop.permute.xlu0 %164 }
  0x86   :  { %291 = vmatpush.bf16.msra.mxu0 %v224_v50  ;;  %1136 = vmatpush.bf16.msra.mxu3 %v224_v50  ;;  %v211_v55 = vmul.f32 %v1068_v48, %v170_v51  ;;  %v210_v56 = vmul.f32 %v1067_v49, %v165_v52  ;;  %v374_v48 = vld [vmem:[#allocation3 + $0x18] sm:$0xff] }
  0x88   :  { %v222_v62 = vpack.c.bf16 %v211_v55, %v210_v56 }
  0x8a   :  { %292 = vmatpush.bf16.msra.mxu0 %v223_v57  ;;  %1137 = vmatpush.bf16.msra.mxu3 %v223_v57 }
  0x8d   :  { %v160_v63 = vpop.permute.xlu0 %159  ;;  %v145_v1 = vpop.permute.xlu1 %144 }
  0x8e   :  { %v209_v4 = vmul.f32 %v1064_v59, %v160_v63  ;;  %293 = vmatpush.bf16.msra.mxu0 %v222_v62  ;;  %1138 = vmatpush.bf16.msra.mxu3 %v222_v62  ;;  %v206_v6 = vmul.f32 %v1059_v61, %v145_v1  ;;  %v375_v59 = vld [vmem:[#allocation3 + $0x20] sm:$0xff] }
  0x90   :  { %v221_v7 = vpack.c.bf16 %v209_v4, %v208_v2  ;;  %v220_v12 = vpack.c.bf16 %v207_v9, %v206_v6 }
  0x92   :  { %294 = vmatpush.bf16.msra.mxu0 %v221_v7  ;;  %1139 = vmatpush.bf16.msra.mxu3 %v221_v7 }
  0x95   :  { %v140_v13 = vpop.permute.xlu1 %139  ;;  %v135_v15 = vpop.permute.xlu0 %134 }
  0x96   :  { %v205_v16 = vmul.f32 %v1056_v10, %v140_v13  ;;  %v204_v17 = vmul.f32 %v1055_v11, %v135_v15  ;;  %295 = vmatpush.bf16.msra.mxu0 %v220_v12  ;;  %1140 = vmatpush.bf16.msra.mxu3 %v220_v12 }
  0x98   :  { %v219_v24 = vpack.c.bf16 %v205_v16, %v204_v17 }
  0x9a   :  { %296 = vmatpush.bf16.msra.mxu0 %v219_v24  ;;  %1141 = vmatpush.bf16.msra.mxu3 %v219_v24 }
  0x9d   :  { %v130_v29 = vpop.permute.xlu0 %129  ;;  %v396_v30 = vpop.f32.mrf.mxu1 }
  0x9e   :  { %v203_v32 = vmul.f32 %v1052_v26, %v130_v29  ;;  %v436_v33 = vadd.f32 %v396_v30, %v371_v28 }
  0xa0   :  { %453 = vst.msk [vmem:[#allocation3] sm:$0xff] %vm41_vm0, %v436_v33  ;;  %v218_v34 = vpack.c.bf16 %v203_v32, %v202_v31 }
  0xa2   :  { %297 = vmatpush.bf16.msra.mxu0 %v218_v34  ;;  %1142 = vmatpush.bf16.msra.mxu3 %v218_v34 }
  0xa5   :  { %298 = vmatmul.bf16.vlgmr.msra.gmra.mxu0 %v1277_v14  ;;  %328 = vmatmul.bf16.vlgmr.msra.gmra.mxu3 %v1367_v35  ;;  %v398_v37 = vpop.f32.mrf.mxu1 }
  0xa6   :  { %1143 = vmatpush.bf16.msrb.mxu3 %v1198_v0  ;;  %v437_v38 = vadd.f32 %v398_v37, %v372_v36  ;;  %v378_v36 = vld [vmem:[#allocation3 + $0x38] sm:$0xff] }
  0xa7   :  { %v472_v39 = vld [vmem:[#allocation3] sm:$0xff] }
  0xa8   :  { %454 = vst.msk [vmem:[#allocation3 + $0x8] sm:$0xff] %vm41_vm0, %v437_v38  ;;  %v488_v40 = vmax.f32 %v472_v39, 1.0 }
  0xaa   :  { %1144 = vmatpush.bf16.msrb.mxu3 %v1198_v0  ;;  %1166 = vrsqrt.f32 %v488_v40  ;;  %vm510_vm1 = vweird.f32 %v488_v40 }
  0xad   :  { %v401_v42 = vpop.f32.mrf.mxu1 }
  0xae   :  { %1145 = vmatpush.bf16.msrb.mxu3 %v1198_v0  ;;  %v438_v43 = vadd.f32 %v401_v42, %v373_v41 }
  0xaf   :  { %v473_v44 = vld [vmem:[#allocation3 + $0x8] sm:$0xff] }
  0xb0   :  { %v1167_v14 = vpop.eup %1166  ;;  %455 = vst.msk [vmem:[#allocation3 + $0x10] sm:$0xff] %vm41_vm0, %v438_v43  ;;  %v489_v45 = vmax.f32 %v473_v44, 1.0 }
  0xb1   :  { %v505_v47 = vmul.f32 %v1167_v14, %v488_v40  ;;  %vm511_vm2 = vweird.f32 %v1167_v14 }
  0xb2   :  { %1146 = vmatpush.bf16.msrb.mxu3 %v1198_v0  ;;  %1168 = vrsqrt.f32 %v489_v45  ;;  %vm512_vm3 = vmor %vm510_vm1, %vm511_vm2  ;;  %vm520_vm4 = vweird.f32 %v489_v45 }
  0xb3   :  { %v506_v49 = vmul.f32 %v1167_v14, %v505_v47 }
  0xb5   :  { %303 = vmatmul.bf16.gmra.mxu0 %v1296_v19  ;;  %333 = vmatmul.bf16.gmra.mxu3 %v1380_v46  ;;  %v403_v50 = vpop.f32.mrf.mxu1  ;;  %v507_v51 = vmul.f32 0.5, %v506_v49 }
  0xb6   :  { %1147 = vmatpush.bf16.msrb.mxu3 %v1198_v0  ;;  %v439_v52 = vadd.f32 %v403_v50, %v374_v48  ;;  %v379_v48 = vld [vmem:[#allocation3 + $0x40] sm:$0xff] }
  0xb7   :  { %v508_v53 = vsub.f32 1.5, %v507_v51  ;;  %v474_v54 = vld [vmem:[#allocation3 + $0x10] sm:$0xff] }
  0xb8   :  { %v1169_v55 = vpop.eup %1168  ;;  %456 = vst.msk [vmem:[#allocation3 + $0x18] sm:$0xff] %vm41_vm0, %v439_v52  ;;  %v490_v56 = vmax.f32 %v474_v54, 1.0 }
  0xb9   :  { %v509_v57 = vmul.f32 %v1167_v14, %v508_v53  ;;  %v515_v58 = vmul.f32 %v1169_v55, %v489_v45  ;;  %vm521_vm5 = vweird.f32 %v1169_v55 }
  0xba   :  { %1148 = vmatpush.bf16.msrb.mxu3 %v1198_v0  ;;  %1170 = vrsqrt.f32 %v490_v56  ;;  %vm522_vm6 = vmor %vm520_vm4, %vm521_vm5  ;;  %vm530_vm7 = vweird.f32 %v490_v56 }
  0xbb   :  { %v513_v19 = vsel %vm512_vm3, %v1167_v14, %v509_v57  ;;  %v516_v60 = vmul.f32 %v1169_v55, %v515_v58  ;;  %v380_v58 = vld [vmem:[#allocation3 + $0x48] sm:$0xff] }
  0xbc   :  { %803 = vperm.xlu1 %1163, %v513_v19  }
  0xbd   :  { %v406_v61 = vpop.f32.mrf.mxu1  ;;  %v517_v62 = vmul.f32 0.5, %v516_v60 }
  0xbe   :  { %1149 = vmatpush.bf16.msrb.mxu3 %v1198_v0  ;;  %v440_v63 = vadd.f32 %v406_v61, %v375_v59 }
  0xbf   :  { %v518_v1 = vsub.f32 1.5, %v517_v62  ;;  %v475_v2 = vld [vmem:[#allocation3 + $0x18] sm:$0xff] }
  0xc0   :  { %v1171_v3 = vpop.eup %1170  ;;  %457 = vst.msk [vmem:[#allocation3 + $0x20] sm:$0xff] %vm41_vm0, %v440_v63  ;;  %v491_v4 = vmax.f32 %v475_v2, 1.0 }
  0xc1   :  { %v519_v5 = vmul.f32 %v1169_v55, %v518_v1  ;;  %v525_v6 = vmul.f32 %v1171_v3, %v490_v56  ;;  %vm531_vm8 = vweird.f32 %v1171_v3 }
  0xc2   :  { %1150 = vmatpush.bf16.msrb.mxu3 %v1198_v0  ;;  %1172 = vrsqrt.f32 %v491_v4  ;;  %vm532_vm9 = vmor %vm530_vm7, %vm531_vm8  ;;  %vm540_vm10 = vweird.f32 %v491_v4 }
  0xc3   :  { %v523_v7 = vsel %vm522_vm6, %v1169_v55, %v519_v5  ;;  %v526_v9 = vmul.f32 %v1171_v3, %v525_v6  ;;  %v381_v6 = vld [vmem:[#allocation3 + $0x50] sm:$0xff] }
  0xc4   :  { %808 = vperm.xlu2 %1164, %v523_v7  }
  0xc5   :  { %308 = vmatmul.bf16.gmra.mxu0 %v1302_v20  ;;  %425 = vmatmul.bf16.vlgmr.msrb.gmra.mxu3 %v1367_v35  ;;  %v408_v10 = vpop.f32.mrf.mxu1  ;;  %v527_v0 = vmul.f32 0.5, %v526_v9 }
  0xc6   :  { %v441_v11 = vadd.f32 %v408_v10, %v376_v8 }
  0xc7   :  { %v528_v12 = vsub.f32 1.5, %v527_v0  ;;  %v476_v13 = vld [vmem:[#allocation3 + $0x20] sm:$0xff]  ;;  %v1047_v0 = vld [vmem:[%s1482_s3 + $0x30] sm:$0xff] }
  0xc8   :  { %v1173_v15 = vpop.eup %1172  ;;  %458 = vst.msk [vmem:[#allocation3 + $0x28] sm:$0xff] %vm41_vm0, %v441_v11  ;;  %v492_v16 = vmax.f32 %v476_v13, 1.0 }
  0xc9   :  { %v529_v17 = vmul.f32 %v1171_v3, %v528_v12  ;;  %v535_v18 = vmul.f32 %v1173_v15, %v491_v4  ;;  %vm541_vm11 = vweird.f32 %v1173_v15 }
  0xca   :  { %1174 = vrsqrt.f32 %v492_v16  ;;  %vm542_vm12 = vmor %vm540_vm10, %vm541_vm11  ;;  %vm550_vm13 = vweird.f32 %v492_v16 }
  0xcb   :  { %v533_v24 = vsel %vm532_vm9, %v1171_v3, %v529_v17  ;;  %v536_v20 = vmul.f32 %v1173_v15, %v535_v18 }
  0xcc   :  { %813 = vperm.xlu0 %1162, %v533_v24   ;;  %v382_v24 = vld [vmem:[#allocation3 + $0x58] sm:$0xff] }
  0xcd   :  { %v411_v26 = vpop.f32.mrf.mxu1  ;;  %v537_v27 = vmul.f32 0.5, %v536_v20  ;;  %v1046_v20 = vld [vmem:[%s1482_s3 + $0x28] sm:$0xff] }
  0xce   :  { %v442_v28 = vadd.f32 %v411_v26, %v377_v25 }
  0xcf   :  { %v538_v29 = vsub.f32 1.5, %v537_v27  ;;  %v477_v30 = vld [vmem:[#allocation3 + $0x28] sm:$0xff] }
  0xd0   :  { %v1175_v31 = vpop.eup %1174  ;;  %459 = vst.msk [vmem:[#allocation3 + $0x30] sm:$0xff] %vm41_vm0, %v442_v28  ;;  %v493_v32 = vmax.f32 %v477_v30, 1.0 }
  0xd1   :  { %v539_v33 = vmul.f32 %v1173_v15, %v538_v29  ;;  %v545_v34 = vmul.f32 %v1175_v31, %v492_v16  ;;  %vm551_vm14 = vweird.f32 %v1175_v31  ;;  %v1045_v29 = vld [vmem:[%s1482_s3 + $0x20] sm:$0xff] }
  0xd2   :  { %1176 = vrsqrt.f32 %v493_v32  ;;  %vm552_vm15 = vmor %vm550_vm13, %vm551_vm14  ;;  %vm560_vm1 = vweird.f32 %v493_v32 }
  0xd3   :  { %v543_v35 = vsel %vm542_vm12, %v1173_v15, %v539_v33  ;;  %v546_v37 = vmul.f32 %v1175_v31, %v545_v34 }
  0xd4   :  { %818 = vperm.xlu1 %1163, %v543_v35   ;;  %v1044_v35 = vld [vmem:[%s1482_s3 + $0x18] sm:$0xff] }
  0xd5   :  { %313 = vmatmul.bf16.gmra.mxu0 %v1308_v21  ;;  %430 = vmatmul.bf16.gmra.mxu3 %v1380_v46  ;;  %v413_v38 = vpop.f32.mrf.mxu1  ;;  %v547_v39 = vmul.f32 0.5, %v546_v37 }
  0xd6   :  { %v443_v40 = vadd.f32 %v413_v38, %v378_v36 }
  0xd7   :  { %v548_v41 = vsub.f32 1.5, %v547_v39  ;;  %v478_v42 = vld [vmem:[#allocation3 + $0x30] sm:$0xff] }
  0xd8   :  { %v1177_v43 = vpop.eup %1176  ;;  %460 = vst.msk [vmem:[#allocation3 + $0x38] sm:$0xff] %vm41_vm0, %v443_v40  ;;  %v494_v44 = vmax.f32 %v478_v42, 1.0 }
  0xd9   :  { %v549_v14 = vmul.f32 %v1175_v31, %v548_v41  ;;  %v555_v45 = vmul.f32 %v1177_v43, %v493_v32  ;;  %vm561_vm2 = vweird.f32 %v1177_v43 }
  0xda   :  { %1178 = vrsqrt.f32 %v494_v44  ;;  %vm562_vm3 = vmor %vm560_vm1, %vm561_vm2  ;;  %vm570_vm4 = vweird.f32 %v494_v44 }
  0xdb   :  { %v553_v47 = vsel %vm552_vm15, %v1175_v31, %v549_v14  ;;  %v556_v21 = vmul.f32 %v1177_v43, %v555_v45  ;;  %v1043_v14 = vld [vmem:[%s1482_s3 + $0x10] sm:$0xff] }
  0xdc   :  { %823 = vperm.xlu2 %1164, %v553_v47  }
  0xdd   :  { %v416_v46 = vpop.f32.mrf.mxu1  ;;  %v557_v49 = vmul.f32 0.5, %v556_v21 }
  0xde   :  { %v444_v50 = vadd.f32 %v416_v46, %v379_v48  ;;  %v1042_v48 = vld [vmem:[%s1482_s3 + $0x8] sm:$0xff] }
  0xdf   :  { %v558_v51 = vsub.f32 1.5, %v557_v49  ;;  %v479_v52 = vld [vmem:[#allocation3 + $0x38] sm:$0xff] }
  0xe0   :  { %v1179_v53 = vpop.eup %1178  ;;  %461 = vst.msk [vmem:[#allocation3 + $0x40] sm:$0xff] %vm41_vm0, %v444_v50  ;;  %v495_v54 = vmax.f32 %v479_v52, 1.0  ;;  %v1041_v52 = vld [vmem:[%s1482_s3] sm:$0xff] }
  0xe1   :  { %v559_v55 = vmul.f32 %v1177_v43, %v558_v51  ;;  %v565_v56 = vmul.f32 %v1179_v53, %v494_v44  ;;  %vm571_vm5 = vweird.f32 %v1179_v53 }
  0xe2   :  { %1180 = vrsqrt.f32 %v495_v54  ;;  %vm572_vm6 = vmor %vm570_vm4, %vm571_vm5  ;;  %vm580_vm7 = vweird.f32 %v495_v54 }
  0xe3   :  { %v563_v57 = vsel %vm562_vm3, %v1177_v43, %v559_v55  ;;  %v566_v19 = vmul.f32 %v1179_v53, %v565_v56 }
  0xe4   :  { %828 = vperm.xlu0 %1162, %v563_v57  }
  0xe5   :  { %318 = vmatmul.bf16.gmra.mxu0 %v1314_v22  ;;  %v418_v59 = vpop.f32.mrf.mxu1  ;;  %v567_v60 = vmul.f32 0.5, %v566_v19  ;;  %v1048_v22 = vld [vmem:[%s1482_s3 + $0x38] sm:$0xff] }
  0xe6   :  { %v445_v61 = vadd.f32 %v418_v59, %v380_v58  ;;  %752 = vmatpush.bf16.msra.mxu2 %v1048_v22  ;;  %1151 = vmatpush.bf16.msra.mxu3 %v1048_v22  ;;  %v383_v22 = vld [vmem:[#allocation3 + $0x60] sm:$0xff] }
  0xe7   :  { %v568_v62 = vsub.f32 1.5, %v567_v60  ;;  %v480_v63 = vld [vmem:[#allocation3 + $0x40] sm:$0xff] }
  0xe8   :  { %v1181_v1 = vpop.eup %1180  ;;  %462 = vst.msk [vmem:[#allocation3 + $0x48] sm:$0xff] %vm41_vm0, %v445_v61  ;;  %v496_v2 = vmax.f32 %v480_v63, 1.0 }
  0xe9   :  { %v569_v3 = vmul.f32 %v1179_v53, %v568_v62  ;;  %v575_v4 = vmul.f32 %v1181_v1, %v495_v54  ;;  %vm581_vm8 = vweird.f32 %v1181_v1 }
  0xea   :  { %1182 = vrsqrt.f32 %v496_v2  ;;  %vm582_vm9 = vmor %vm580_vm7, %vm581_vm8  ;;  %753 = vmatpush.bf16.msra.mxu2 %v1047_v0  ;;  %1152 = vmatpush.bf16.msra.mxu3 %v1047_v0  ;;  %vm590_vm10 = vweird.f32 %v496_v2 }
  0xeb   :  { %v573_v5 = vsel %vm572_vm6, %v1179_v53, %v569_v3  ;;  %v576_v7 = vmul.f32 %v1181_v1, %v575_v4 }
  0xec   :  { %833 = vperm.xlu1 %1163, %v573_v5  }
  0xed   :  { %v421_v8 = vpop.f32.mrf.mxu1  ;;  %v577_v9 = vmul.f32 0.5, %v576_v7 }
  0xee   :  { %v446_v10 = vadd.f32 %v421_v8, %v381_v6  ;;  %754 = vmatpush.bf16.msra.mxu2 %v1046_v20  ;;  %1153 = vmatpush.bf16.msra.mxu3 %v1046_v20 }
  0xef   :  { %v578_v11 = vsub.f32 1.5, %v577_v9  ;;  %v481_v12 = vld [vmem:[#allocation3 + $0x48] sm:$0xff] }
  0xf0   :  { %v1183_v13 = vpop.eup %1182  ;;  %463 = vst.msk [vmem:[#allocation3 + $0x50] sm:$0xff] %vm41_vm0, %v446_v10  ;;  %v497_v15 = vmax.f32 %v481_v12, 1.0 }
  0xf1   :  { %v579_v16 = vmul.f32 %v1181_v1, %v578_v11  ;;  %v585_v17 = vmul.f32 %v1183_v13, %v496_v2  ;;  %vm591_vm11 = vweird.f32 %v1183_v13  ;;  %v384_v11 = vld [vmem:[#allocation3 + $0x68] sm:$0xff] }
  0xf2   :  { %1184 = vrsqrt.f32 %v497_v15  ;;  %vm592_vm12 = vmor %vm590_vm10, %vm591_vm11  ;;  %755 = vmatpush.bf16.msra.mxu2 %v1045_v29  ;;  %1154 = vmatpush.bf16.msra.mxu3 %v1045_v29  ;;  %vm600_vm13 = vweird.f32 %v497_v15 }
  0xf3   :  { %v583_v18 = vsel %vm582_vm9, %v1181_v1, %v579_v16  ;;  %v586_v25 = vmul.f32 %v1183_v13, %v585_v17 }
  0xf4   :  { %838 = vperm.xlu2 %1164, %v583_v18   ;;  %v385_v18 = vld [vmem:[#allocation3 + $0x70] sm:$0xff] }
  0xf5   :  { %323 = vmatmul.bf16.gmra.mxu0 %v1320_v23  ;;  %v423_v26 = vpop.f32.mrf.mxu1  ;;  %v587_v27 = vmul.f32 0.5, %v586_v25 }
  0xf6   :  { %v447_v28 = vadd.f32 %v423_v26, %v382_v24  ;;  %756 = vmatpush.bf16.msra.mxu2 %v1044_v35  ;;  %1155 = vmatpush.bf16.msra.mxu3 %v1044_v35 }
  0xf7   :  { %v588_v30 = vsub.f32 1.5, %v587_v27  ;;  %v482_v31 = vld [vmem:[#allocation3 + $0x50] sm:$0xff] }
  0xf8   :  { %v1185_v32 = vpop.eup %1184  ;;  %464 = vst.msk [vmem:[#allocation3 + $0x58] sm:$0xff] %vm41_vm0, %v447_v28  ;;  %v498_v33 = vmax.f32 %v482_v31, 1.0  ;;  %v386_v31 = vld [vmem:[#allocation3 + $0x78] sm:$0xff] }
  0xf9   :  { %v589_v34 = vmul.f32 %v1183_v13, %v588_v30  ;;  %v595_v23 = vmul.f32 %v1185_v32, %v497_v15  ;;  %vm601_vm14 = vweird.f32 %v1185_v32 }
  0xfa   :  { %1186 = vrsqrt.f32 %v498_v33  ;;  %vm602_vm15 = vmor %vm600_vm13, %vm601_vm14  ;;  %757 = vmatpush.bf16.msra.mxu2 %v1043_v14  ;;  %1156 = vmatpush.bf16.msra.mxu3 %v1043_v14  ;;  %vm610_vm1 = vweird.f32 %v498_v33 }
  0xfb   :  { %v593_v36 = vsel %vm592_vm12, %v1183_v13, %v589_v34  ;;  %v596_v37 = vmul.f32 %v1185_v32, %v595_v23 }
  0xfc   :  { %843 = vperm.xlu0 %1162, %v593_v36  }
  0xfd   :  { %v597_v38 = vmul.f32 0.5, %v596_v37 }
  0xfe   :  { %758 = vmatpush.bf16.msra.mxu2 %v1042_v48  ;;  %1157 = vmatpush.bf16.msra.mxu3 %v1042_v48 }
  0xff   :  { %v598_v39 = vsub.f32 1.5, %v597_v38  ;;  %v483_v40 = vld [vmem:[#allocation3 + $0x58] sm:$0xff] }
 0x100   :  { %v1187_v41 = vpop.eup %1186  ;;  %v499_v42 = vmax.f32 %v483_v40, 1.0 }
 0x101   :  { %v599_v43 = vmul.f32 %v1185_v32, %v598_v39  ;;  %v605_v44 = vmul.f32 %v1187_v41, %v498_v33  ;;  %vm611_vm2 = vweird.f32 %v1187_v41 }
 0x102   :  { %1188 = vrsqrt.f32 %v499_v42  ;;  %vm612_vm3 = vmor %vm610_vm1, %vm611_vm2  ;;  %759 = vmatpush.bf16.msra.mxu2 %v1041_v52  ;;  %1158 = vmatpush.bf16.msra.mxu3 %v1041_v52  ;;  %vm620_vm4 = vweird.f32 %v499_v42 }
 0x103   :  { %v603_v45 = vsel %vm602_vm15, %v1185_v32, %v599_v43  ;;  %v606_v47 = vmul.f32 %v1187_v41, %v605_v44 }
 0x104   :  { %848 = vperm.xlu1 %1163, %v603_v45  }
 0x105   :  { %v607_v21 = vmul.f32 0.5, %v606_v47 }
 0x107   :  { %v608_v46 = vsub.f32 1.5, %v607_v21 }
 0x108   :  { %v1189_v49 = vpop.eup %1188 }
 0x109   :  { %v609_v50 = vmul.f32 %v1187_v41, %v608_v46  ;;  %v615_v51 = vmul.f32 %v1189_v49, %v499_v42  ;;  %vm621_vm5 = vweird.f32 %v1189_v49 }
 0x10a   :  { %vm622_vm6 = vmor %vm620_vm4, %vm621_vm5 }
 0x10b   :  { %v613_v53 = vsel %vm612_vm3, %v1187_v41, %v609_v50  ;;  %v616_v54 = vmul.f32 %v1189_v49, %v615_v51 }
 0x10c   :  { %853 = vperm.xlu2 %1164, %v613_v53  }
 0x10d   :  { %v617_v55 = vmul.f32 0.5, %v616_v54 }
 0x10f   :  { %v618_v56 = vsub.f32 1.5, %v617_v55 }
 0x111   :  { %v619_v57 = vmul.f32 %v1189_v49, %v618_v56 }
 0x113   :  { %v623_v58 = vsel %vm622_vm6, %v1189_v49, %v619_v57 }
 0x114   :  { %858 = vperm.xlu0 %1162, %v623_v58  }
 0x122   :  { %v299_v19 = vpop.f32.mrf.mxu0 }
 0x128   :  { %v329_v59 = vpop.f32.mrf.mxu3 }
 0x12a   :  { %v301_v60 = vpop.f32.mrf.mxu0 }
 0x12b   :  { %v680_v61 = vpack.c.bf16 %v301_v60, %v299_v19 }
 0x12d   :  { %760 = vmatmul.bf16.vlgmr.msra.gmra.mxu2 %v680_v61 }
 0x130   :  { %v331_v62 = vpop.f32.mrf.mxu3 }
 0x131   :  { %v686_v63 = vpack.c.bf16 %v331_v62, %v329_v59 }
 0x132   :  { %v304_v1 = vpop.f32.mrf.mxu0 }
 0x133   :  { %790 = vmatmul.bf16.vlgmr.msra.gmra.mxu3 %v686_v63 }
 0x138   :  { %v334_v2 = vpop.f32.mrf.mxu3 }
 0x13a   :  { %v306_v3 = vpop.f32.mrf.mxu0 }
 0x13b   :  { %v681_v4 = vpack.c.bf16 %v306_v3, %v304_v1 }
 0x13d   :  { %765 = vmatmul.bf16.gmra.mxu2 %v681_v4  ;;  %v809_v4 = vpop.permute.xlu2 %808 }
 0x140   :  { %v336_v5 = vpop.f32.mrf.mxu3 }
 0x141   :  { %v687_v6 = vpack.c.bf16 %v336_v5, %v334_v2  ;;  %v804_v5 = vpop.permute.xlu1 %803 }
 0x142   :  { %v309_v7 = vpop.f32.mrf.mxu0 }
 0x143   :  { %795 = vmatmul.bf16.gmra.mxu3 %v687_v6 }
 0x148   :  { %v426_v8 = vpop.f32.mrf.mxu3 }
 0x149   :  { %v448_v9 = vadd.f32 %v426_v8, %v383_v22 }
 0x14a   :  { %v311_v10 = vpop.f32.mrf.mxu0 }
 0x14b   :  { %465 = vst.msk [vmem:[#allocation3 + $0x60] sm:$0xff] %vm41_vm0, %v448_v9  ;;  %v682_v0 = vpack.c.bf16 %v311_v10, %v309_v7  ;;  %v1434_v7 = vld [vmem:[%s1483_s4] ss:$0 sm:$0xff]  ;;  %v824_v10 = vpop.permute.xlu2 %823 }
 0x14d   :  { %770 = vmatmul.bf16.gmra.mxu2 %v682_v0 }
 0x150   :  { %v428_v12 = vpop.f32.mrf.mxu3 }
 0x151   :  { %v449_v13 = vadd.f32 %v428_v12, %v384_v11 }
 0x152   :  { %v314_v15 = vpop.f32.mrf.mxu0  ;;  %v484_v16 = vld [vmem:[#allocation3 + $0x60] sm:$0xff] }
 0x153   :  { %466 = vst.msk [vmem:[#allocation3 + $0x68] sm:$0xff] %vm41_vm0, %v449_v13  ;;  %v500_v17 = vmax.f32 %v484_v16, 1.0  ;;  %v819_v16 = vpop.permute.xlu1 %818 }
 0x155   :  { %1190 = vrsqrt.f32 %v500_v17  ;;  %vm630_vm7 = vweird.f32 %v500_v17 }
 0x158   :  { %v431_v24 = vpop.f32.mrf.mxu3 }
 0x159   :  { %v450_v25 = vadd.f32 %v431_v24, %v385_v18  ;;  %v814_v18 = vpop.permute.xlu0 %813 }
 0x15a   :  { %v316_v20 = vpop.f32.mrf.mxu0  ;;  %v485_v26 = vld [vmem:[#allocation3 + $0x68] sm:$0xff] }
 0x15b   :  { %v1191_v27 = vpop.eup %1190  ;;  %467 = vst.msk [vmem:[#allocation3 + $0x70] sm:$0xff] %vm41_vm0, %v450_v25  ;;  %v683_v28 = vpack.c.bf16 %v316_v20, %v314_v15  ;;  %v501_v29 = vmax.f32 %v485_v26, 1.0 }
 0x15c   :  { %v625_v30 = vmul.f32 %v1191_v27, %v500_v17  ;;  %vm631_vm8 = vweird.f32 %v1191_v27  ;;  %v839_v17 = vpop.permute.xlu2 %838 }
 0x15d   :  { %775 = vmatmul.bf16.gmra.mxu2 %v683_v28  ;;  %1192 = vrsqrt.f32 %v501_v29  ;;  %vm632_vm9 = vmor %vm630_vm7, %vm631_vm8  ;;  %vm640_vm10 = vweird.f32 %v501_v29 }
 0x15e   :  { %v626_v32 = vmul.f32 %v1191_v27, %v625_v30  ;;  %v834_v20 = vpop.permute.xlu1 %833 }
 0x160   :  { %v433_v33 = vpop.f32.mrf.mxu3  ;;  %v627_v34 = vmul.f32 0.5, %v626_v32 }
 0x161   :  { %v451_v23 = vadd.f32 %v433_v33, %v386_v31 }
 0x162   :  { %v319_v35 = vpop.f32.mrf.mxu0  ;;  %v628_v36 = vsub.f32 1.5, %v627_v34  ;;  %v486_v37 = vld [vmem:[#allocation3 + $0x70] sm:$0xff] }
 0x163   :  { %v1193_v38 = vpop.eup %1192  ;;  %468 = vst.msk [vmem:[#allocation3 + $0x78] sm:$0xff] %vm41_vm0, %v451_v23  ;;  %v502_v39 = vmax.f32 %v486_v37, 1.0 }
 0x164   :  { %v629_v40 = vmul.f32 %v1191_v27, %v628_v36  ;;  %v635_v41 = vmul.f32 %v1193_v38, %v501_v29  ;;  %vm641_vm11 = vweird.f32 %v1193_v38 }
 0x165   :  { %1194 = vrsqrt.f32 %v502_v39  ;;  %vm642_vm12 = vmor %vm640_vm10, %vm641_vm11  ;;  %vm650_vm0 = vweird.f32 %v502_v39 }
 0x166   :  { %v633_v42 = vsel %vm632_vm9, %v1191_v27, %v629_v40  ;;  %v636_v43 = vmul.f32 %v1193_v38, %v635_v41  ;;  %v1442_v28 = vpop.permute.xlu2 %853 }
 0x167   :  { %863 = vperm.xlu1 %1163, %v633_v42  }
 0x168   :  { %v637_v44 = vmul.f32 0.5, %v636_v43 }
 0x16a   :  { %v321_v14 = vpop.f32.mrf.mxu0  ;;  %v638_v45 = vsub.f32 1.5, %v637_v44  ;;  %v487_v47 = vld [vmem:[#allocation3 + $0x78] sm:$0xff] }
 0x16b   :  { %v1195_v48 = vpop.eup %1194  ;;  %v684_v21 = vpack.c.bf16 %v321_v14, %v319_v35  ;;  %v503_v46 = vmax.f32 %v487_v47, 1.0  ;;  %v829_v35 = vpop.permute.xlu0 %828 }
 0x16c   :  { %v639_v49 = vmul.f32 %v1193_v38, %v638_v45  ;;  %v645_v50 = vmul.f32 %v1195_v48, %v502_v39  ;;  %vm651_vm13 = vweird.f32 %v1195_v48 }
 0x16d   :  { %780 = vmatmul.bf16.gmra.mxu2 %v684_v21  ;;  %1196 = vrsqrt.f32 %v503_v46  ;;  %vm652_vm14 = vmor %vm650_vm0, %vm651_vm13  ;;  %vm660_vm15 = vweird.f32 %v503_v46 }
 0x16e   :  { %v643_v51 = vsel %vm642_vm12, %v1193_v38, %v639_v49  ;;  %v646_v52 = vmul.f32 %v1195_v48, %v645_v50 }
 0x16f   :  { %868 = vperm.xlu2 %1164, %v643_v51  }
 0x170   :  { %v647_v53 = vmul.f32 0.5, %v646_v52 }
 0x172   :  { %v324_v54 = vpop.f32.mrf.mxu0  ;;  %v648_v55 = vsub.f32 1.5, %v647_v53 }
 0x173   :  { %v1197_v56 = vpop.eup %1196  ;;  %v844_v45 = vpop.permute.xlu0 %843 }
 0x174   :  { %v649_v57 = vmul.f32 %v1195_v48, %v648_v55  ;;  %v655_v58 = vmul.f32 %v1197_v56, %v503_v46  ;;  %vm661_vm1 = vweird.f32 %v1197_v56 }
 0x175   :  { %vm662_vm2 = vmor %vm660_vm15, %vm661_vm1 }
 0x176   :  { %v653_v19 = vsel %vm652_vm14, %v1195_v48, %v649_v57  ;;  %v656_v59 = vmul.f32 %v1197_v56, %v655_v58  ;;  %v849_v23 = vpop.permute.xlu1 %848 }
 0x177   :  { %873 = vperm.xlu0 %1162, %v653_v19  }
 0x178   :  { %v657_v60 = vmul.f32 0.5, %v656_v59 }
 0x17a   :  { %v326_v61 = vpop.f32.mrf.mxu0  ;;  %v658_v62 = vsub.f32 1.5, %v657_v60 }
 0x17b   :  { %v685_v63 = vpack.c.bf16 %v326_v61, %v324_v54 }
 0x17c   :  { %v659_v1 = vmul.f32 %v1197_v56, %v658_v62 }
 0x17d   :  { %785 = vmatmul.bf16.gmra.mxu2 %v685_v63 }
 0x17e   :  { %v663_v2 = vsel %vm662_vm2, %v1197_v56, %v659_v1 }
 0x17f   :  { %878 = vperm.xlu1 %1163, %v663_v2  }
 0x186   :  { %v859_v54 = vpop.permute.xlu0 %858 }
 0x1b0   :  { %v761_v3 = vpop.f32.mrf.mxu2 }
 0x1b1   :  { %v881_v6 = vmul.f32 %v804_v5, %v761_v3 }
 0x1b3   :  { %v901_v8 = vadd.f32 %v1434_v7, %v881_v6 }
 0x1b5   :  { %v917_v11 = vmax.f32 %v901_v8, 0.0 }
 0x1b6   :  { %v791_v29 = vpop.f32.mrf.mxu3 }
 0x1b8   :  { %v763_v22 = vpop.f32.mrf.mxu2 }
 0x1b9   :  { %v882_v9 = vmul.f32 %v809_v4, %v763_v22 }
 0x1bb   :  { %v902_v0 = vadd.f32 %v1434_v7, %v882_v9 }
 0x1bd   :  { %v918_v12 = vmax.f32 %v902_v0, 0.0 }
 0x1be   :  { %v793_v37 = vpop.f32.mrf.mxu3 }
 0x1bf   :  { %v1084_v13 = vpack.c.bf16 %v918_v12, %v917_v11 }
 0x1c0   :  { %v766_v15 = vpop.f32.mrf.mxu2 }
 0x1c1   :  { %1085 = vst [vmem:[%s1484_s5] sm:$0xff] %v1084_v13   ;;  %v883_v24 = vmul.f32 %v814_v18, %v766_v15 }
 0x1c3   :  { %v903_v26 = vadd.f32 %v1434_v7, %v883_v24 }
 0x1c5   :  { %v919_v31 = vmax.f32 %v903_v26, 0.0 }
 0x1c6   :  { %v796_v56 = vpop.f32.mrf.mxu3 }
 0x1c8   :  { %v768_v25 = vpop.f32.mrf.mxu2 }
 0x1c9   :  { %v884_v27 = vmul.f32 %v819_v16, %v768_v25  ;;  %v869_v36 = vpop.permute.xlu2 %868 }
 0x1ca   :  { %v894_v39 = vmul.f32 %v869_v36, %v793_v37 }
 0x1cb   :  { %v904_v30 = vadd.f32 %v1434_v7, %v884_v27 }
 0x1cc   :  { %v914_v44 = vadd.f32 %v1434_v7, %v894_v39 }
 0x1cd   :  { %v920_v32 = vmax.f32 %v904_v30, 0.0 }
 0x1ce   :  { %v930_v49 = vmax.f32 %v914_v44, 0.0  ;;  %v798_v3 = vpop.f32.mrf.mxu3 }
 0x1cf   :  { %v1089_v33 = vpack.c.bf16 %v920_v32, %v919_v31 }
 0x1d0   :  { %v771_v34 = vpop.f32.mrf.mxu2 }
 0x1d1   :  { %1128 = vst [vmem:[%s1484_s5 + $0x8] sm:$0xff] %v1089_v33   ;;  %v885_v38 = vmul.f32 %v824_v10, %v771_v34 }
 0x1d3   :  { %v905_v41 = vadd.f32 %v1434_v7, %v885_v38 }
 0x1d5   :  { %v921_v21 = vmax.f32 %v905_v41, 0.0 }
 0x1d8   :  { %v773_v40 = vpop.f32.mrf.mxu2 }
 0x1d9   :  { %v886_v42 = vmul.f32 %v829_v35, %v773_v40  ;;  %v864_v43 = vpop.permute.xlu1 %863 }
 0x1da   :  { %v893_v14 = vmul.f32 %v864_v43, %v791_v29 }
 0x1db   :  { %v906_v47 = vadd.f32 %v1434_v7, %v886_v42 }
 0x1dc   :  { %v913_v48 = vadd.f32 %v1434_v7, %v893_v14 }
 0x1dd   :  { %v922_v46 = vmax.f32 %v906_v47, 0.0 }
 0x1de   :  { %v929_v50 = vmax.f32 %v913_v48, 0.0 }
 0x1df   :  { %v1094_v51 = vpack.c.bf16 %v922_v46, %v921_v21 }
 0x1e0   :  { %v1114_v52 = vpack.c.bf16 %v930_v49, %v929_v50  ;;  %v776_v53 = vpop.f32.mrf.mxu2 }
 0x1e1   :  { %1129 = vst [vmem:[%s1484_s5 + $0x10] sm:$0xff] %v1094_v51   ;;  %v887_v55 = vmul.f32 %v834_v20, %v776_v53 }
 0x1e2   :  { %1133 = vst [vmem:[%s1484_s5 + $0x30] sm:$0xff] %v1114_v52  }
 0x1e3   :  { %v907_v58 = vadd.f32 %v1434_v7, %v887_v55 }
 0x1e5   :  { %v923_v61 = vmax.f32 %v907_v58, 0.0 }
 0x1e8   :  { %v778_v57 = vpop.f32.mrf.mxu2 }
 0x1e9   :  { %v888_v19 = vmul.f32 %v839_v17, %v778_v57  ;;  %v874_v60 = vpop.permute.xlu0 %873 }
 0x1ea   :  { %v895_v63 = vmul.f32 %v874_v60, %v796_v56 }
 0x1eb   :  { %v908_v59 = vadd.f32 %v1434_v7, %v888_v19 }
 0x1ec   :  { %v915_v5 = vadd.f32 %v1434_v7, %v895_v63 }
 0x1ed   :  { %v924_v62 = vmax.f32 %v908_v59, 0.0 }
 0x1ee   :  { %v931_v9 = vmax.f32 %v915_v5, 0.0 }
 0x1ef   :  { %v1099_v1 = vpack.c.bf16 %v924_v62, %v923_v61 }
 0x1f0   :  { %v781_v2 = vpop.f32.mrf.mxu2 }
 0x1f1   :  { %1130 = vst [vmem:[%s1484_s5 + $0x18] sm:$0xff] %v1099_v1   ;;  %v879_v4 = vpop.permute.xlu1 %878  ;;  %v889_v8 = vmul.f32 %v844_v45, %v781_v2 }
 0x1f2   :  { %v896_v6 = vmul.f32 %v879_v4, %v798_v3 }
 0x1f3   :  { %v909_v12 = vadd.f32 %v1434_v7, %v889_v8 }
 0x1f4   :  { %v916_v22 = vadd.f32 %v1434_v7, %v896_v6 }
 0x1f5   :  { %v925_v16 = vmax.f32 %v909_v12, 0.0 }
 0x1f6   :  { %v932_v10 = vmax.f32 %v916_v22, 0.0 }
 0x1f8   :  { %v1119_v0 = vpack.c.bf16 %v932_v10, %v931_v9  ;;  %v783_v11 = vpop.f32.mrf.mxu2 }
 0x1f9   :  { %v890_v13 = vmul.f32 %v849_v23, %v783_v11 }
 0x1fa   :  { %1134 = vst [vmem:[%s1484_s5 + $0x38] sm:$0xff] %v1119_v0  }
 0x1fb   :  { %v910_v15 = vadd.f32 %v1434_v7, %v890_v13 }
 0x1fd   :  { %v926_v17 = vmax.f32 %v910_v15, 0.0 }
 0x1ff   :  { %v1104_v18 = vpack.c.bf16 %v926_v17, %v925_v16 }
 0x200   :  { %v786_v24 = vpop.f32.mrf.mxu2 }
 0x201   :  { %1131 = vst [vmem:[%s1484_s5 + $0x20] sm:$0xff] %v1104_v18   ;;  %v891_v25 = vmul.f32 %v1442_v28, %v786_v24 }
 0x203   :  { %v911_v26 = vadd.f32 %v1434_v7, %v891_v25 }
 0x205   :  { %v927_v30 = vmax.f32 %v911_v26, 0.0 }
 0x208   :  { %v788_v20 = vpop.f32.mrf.mxu2 }
 0x209   :  { %v892_v27 = vmul.f32 %v859_v54, %v788_v20 }
 0x20b   :  { %v912_v29 = vadd.f32 %v1434_v7, %v892_v27 }
 0x20d   :  { %v928_v31 = vmax.f32 %v912_v29, 0.0 }
 0x20f   :  { %v1109_v32 = vpack.c.bf16 %v928_v31, %v927_v30 }
 0x211   :  { %1132 = vst [vmem:[%s1484_s5 + $0x28] sm:$0xff] %v1109_v32  }

</bundles_post_ra>
